<compile_context>
chip_gen: v7x
topology: tpu7x:2x2x1
jax: 0.10.0
libtpu: 0.0.40
codegen_flags: <defaults>
</compile_context>

<pallas_src>
import jax
import jax.numpy as jnp
from jax.experimental import pallas as pl
from jax.experimental.pallas import tpu as pltpu

D_IN = 3 * 2048     # 6144
N_PAD = 128         # lane-dense padded width for all hidden/output layers


def _sigmoid(z):
    # tanh goes to the EUP (free VLIW slot); avoids exp overflow to inf.
    return 0.5 * jnp.tanh(0.5 * z) + 0.5


def mlp_kernel(x_ref, w1_ref, ws_ref, b_ref, o_ref):
    # In-kernel cast to bf16 (VPU work, hidden under the x DMA); fc1 runs as a
    # native bf16 MXU matmul with f32 accumulation.
    x = x_ref[...].astype(jnp.bfloat16)
    h = jnp.dot(x, w1_ref[...], preferred_element_type=jnp.float32)
    h = _sigmoid(h + b_ref[0:1, :])

    # fc2..fc4: tiny 128x128 f32 matmuls on VMEM-resident packed weights.
    for i in range(3):
        h = jnp.dot(h, ws_ref[i], preferred_element_type=jnp.float32)
        h = _sigmoid(h + b_ref[i + 1:i + 2, :])

    # Output head (padded to 128 lanes; only column 0 is meaningful).
    o = jnp.dot(h, ws_ref[3], preferred_element_type=jnp.float32) + b_ref[4:5, :]
    o_ref[...] = o.astype(o_ref.dtype)


def pack_params(params):
    """Pad + pack the 5 (W, b) pairs into 3 lane-dense operands.

    Returns:
      w1_p : (6144, 128) bf16   -- fc1 weight, zero-padded cols 100..127
      ws_p : (4, 128, 128) f32  -- fc2, fc3, fc4, out weights, zero-padded
      b_p  : (8, 128) f32       -- rows 0..4 = b1..b5 (zero-padded), rows 5..7 pad
    """
    (w1, b1), (w2, b2), (w3, b3), (w4, b4), (w5, b5) = params

    def pad_small(w):
        out = jnp.zeros((N_PAD, N_PAD), jnp.float32)
        return out.at[:w.shape[0], :w.shape[1]].set(w)

    w1_p = jnp.zeros((D_IN, N_PAD), jnp.float32).at[:, :w1.shape[1]].set(w1)
    w1_p = w1_p.astype(jnp.bfloat16)
    ws_p = jnp.stack([pad_small(w2), pad_small(w3), pad_small(w4), pad_small(w5)])

    b_p = jnp.zeros((8, N_PAD), jnp.float32)
    for i, b in enumerate([b1, b2, b3, b4, b5]):
        b_p = b_p.at[i, :b.shape[0]].set(b)
    return w1_p, ws_p, b_p


def net_forward(x, packed, *, tb=512):
    """x: [B, 6144] (f32 or bf16); packed: output of pack_params. Returns [B, 1] f32."""
    w1_p, ws_p, b_p = packed
    B, d_in = x.shape
    assert d_in == D_IN

    # Batch tile: never larger than B (so the block is always legal), multiple
    # of 8 sublanes when B >= 8; a partial last tile handles the remainder
    # instead of padding x all the way up to a tile multiple.
    tb = min(tb, B)
    if tb > 8:
        tb -= tb % 8
    grid = (pl.cdiv(B, tb),)

    itemsize = jnp.dtype(x.dtype).itemsize
    cost = pl.CostEstimate(
        flops=2 * B * D_IN * N_PAD + 2 * 4 * B * N_PAD * N_PAD,
        transcendentals=4 * B * N_PAD,
        bytes_accessed=(x.size * itemsize + w1_p.size * 2 + ws_p.size * 4
                        + b_p.size * 4 + B * N_PAD * 4),
    )

    out_padded = pl.pallas_call(
        mlp_kernel,
        out_shape=jax.ShapeDtypeStruct((B, N_PAD), jnp.float32),
        grid=grid,
        in_specs=[
            # x: streamed over the batch, double-buffered (default).
            pl.BlockSpec((tb, D_IN), lambda i: (i, 0)),
            # Constant-index operands: DMA'd once, single-buffered to save VMEM.
            pl.BlockSpec((D_IN, N_PAD), lambda i: (0, 0),
                         pipeline_mode=pl.Buffered(1)),
            pl.BlockSpec((4, N_PAD, N_PAD), lambda i: (0, 0, 0),
                         pipeline_mode=pl.Buffered(1)),
            pl.BlockSpec((8, N_PAD), lambda i: (0, 0),
                         pipeline_mode=pl.Buffered(1)),
        ],
        out_specs=pl.BlockSpec((tb, N_PAD), lambda i: (i, 0)),
        compiler_params=pltpu.CompilerParams(
            # "parallel" lets v7x shard the batch axis across its 2 TensorCores;
            # it is a no-op on single-TC v5e/v6e.
            dimension_semantics=("parallel",),
            vmem_limit_bytes=48 * 1024 * 1024,   # <= 64 MiB v7x physical VMEM
        ),
        cost_estimate=cost,
    )(x, w1_p, ws_p, b_p)

    # Only lane 0 of the padded output is meaningful.
    return out_padded[:, 0:1]


def init_params(key):
    """PyTorch-style Linear init: U(-1/sqrt(fan_in), 1/sqrt(fan_in))."""
    dims = [(D_IN, 100), (100, 20), (20, 20), (20, 20), (20, 1)]
    params = []
    for fan_in, fan_out in dims:
        key, kw, kb = jax.random.split(key, 3)
        bound = 1.0 / jnp.sqrt(jnp.float32(fan_in))
        w = jax.random.uniform(kw, (fan_in, fan_out), jnp.float32,
                               minval=-bound, maxval=bound)
        b = jax.random.uniform(kb, (fan_out,), jnp.float32,
                               minval=-bound, maxval=bound)
        params.append((w, b))
    return params


def net_forward_ref(x, params):
    """Pure-JAX reference, quantizing x / fc1-weight to bf16 like the kernel."""
    w1, b1 = params[0]
    xq = x.astype(jnp.bfloat16).astype(jnp.float32)
    w1q = w1.astype(jnp.bfloat16).astype(jnp.float32)
    h = jax.nn.sigmoid(xq @ w1q + b1)
    for w, b in params[1:-1]:
        h = jax.nn.sigmoid(h @ w + b)
    w5, b5 = params[-1]
    return h @ w5 + b5


if __name__ == "__main__":
    key = jax.random.PRNGKey(0)
    key, kx = jax.random.split(key)

    B = 8
    x = jax.random.normal(kx, (B, D_IN), jnp.float32)
    params = init_params(key)
    packed = pack_params(params)

    out = net_forward(x, packed)
    jax.block_until_ready(out)

    ref = net_forward_ref(x, params)
    assert out.shape == (B, 1), out.shape
    max_err = jnp.max(jnp.abs(out - ref))
    assert jnp.allclose(out, ref, atol=5e-3, rtol=5e-3), f"max abs err {max_err}"

    print("KERNEL_OK")
</pallas_src>

<mosaic_0001>
module attributes {stable_mosaic.version = 11 : i64} {
  func.func @mlp_kernel(%arg0: i32, %arg1: memref<8x6144xf32, #tpu.memory_space<vmem>>, %arg2: memref<6144x128xbf16, #tpu.memory_space<vmem>>, %arg3: memref<4x128x128xf32, #tpu.memory_space<vmem>>, %arg4: memref<8x128xf32, #tpu.memory_space<vmem>>, %arg5: memref<8x128xf32, #tpu.memory_space<vmem>>) attributes {dimension_semantics = [#tpu.dimension_semantics<parallel>], iteration_bounds = array<i64: 1>, scalar_prefetch = 0 : i64, scratch_operands = 0 : i64, tpu.core_type = #tpu.core_type<tc>, window_params = [{transform_indices = @transform_0, window_bounds = array<i64: 8, 6144>}, {pipeline_mode = #tpu.pipeline_mode<synchronous>, transform_indices = @transform_1, window_bounds = array<i64: 6144, 128>}, {pipeline_mode = #tpu.pipeline_mode<synchronous>, transform_indices = @transform_2, window_bounds = array<i64: 4, 128, 128>}, {pipeline_mode = #tpu.pipeline_mode<synchronous>, transform_indices = @transform_3, window_bounds = array<i64: 8, 128>}, {transform_indices = @transform_4, window_bounds = array<i64: 8, 128>}]} {
    %c0 = arith.constant 0 : index
    %c0_0 = arith.constant 0 : index
    %0 = vector.load %arg1[%c0, %c0_0] : memref<8x6144xf32, #tpu.memory_space<vmem>>, vector<8x6144xf32>
    %1 = arith.truncf %0 : vector<8x6144xf32> to vector<8x6144xbf16>
    %c0_1 = arith.constant 0 : index
    %c0_2 = arith.constant 0 : index
    %2 = vector.load %arg2[%c0_1, %c0_2] : memref<6144x128xbf16, #tpu.memory_space<vmem>>, vector<6144x128xbf16>
    %cst = arith.constant dense<0.000000e+00> : vector<8x128xf32>
    %3 = tpu.matmul %1, %2, %cst {dimension_numbers = #tpu.dot_dimension_numbers<[1], [0], [0], [1], [0, 0, 1, 1], [], []>} : vector<8x6144xbf16>, vector<6144x128xbf16>, vector<8x128xf32> -> vector<8x128xf32>
    %c0_3 = arith.constant 0 : index
    %c0_4 = arith.constant 0 : index
    %4 = vector.load %arg4[%c0_3, %c0_4] : memref<8x128xf32, #tpu.memory_space<vmem>>, vector<1x128xf32>
    %5 = vector.broadcast %4 : vector<1x128xf32> to vector<8x128xf32>
    %6 = arith.addf %3, %5 : vector<8x128xf32>
    %cst_5 = arith.constant 5.000000e-01 : f32
    %7 = vector.broadcast %cst_5 : f32 to vector<8x128xf32>
    %8 = arith.mulf %7, %6 : vector<8x128xf32>
    %9 = math.tanh %8 : vector<8x128xf32>
    %cst_6 = arith.constant 5.000000e-01 : f32
    %10 = vector.broadcast %cst_6 : f32 to vector<8x128xf32>
    %11 = arith.mulf %10, %9 : vector<8x128xf32>
    %cst_7 = arith.constant 5.000000e-01 : f32
    %12 = vector.broadcast %cst_7 : f32 to vector<8x128xf32>
    %13 = arith.addf %11, %12 : vector<8x128xf32>
    %c0_8 = arith.constant 0 : index
    %c0_9 = arith.constant 0 : index
    %c0_10 = arith.constant 0 : index
    %14 = vector.load %arg3[%c0_8, %c0_9, %c0_10] : memref<4x128x128xf32, #tpu.memory_space<vmem>>, vector<1x128x128xf32>
    %15 = vector.shape_cast %14 : vector<1x128x128xf32> to vector<128x128xf32>
    %cst_11 = arith.constant dense<0.000000e+00> : vector<8x128xf32>
    %16 = tpu.matmul %13, %15, %cst_11 {dimension_numbers = #tpu.dot_dimension_numbers<[1], [0], [0], [1], [0, 0, 1, 1], [], []>} : vector<8x128xf32>, vector<128x128xf32>, vector<8x128xf32> -> vector<8x128xf32>
    %c1 = arith.constant 1 : index
    %c0_12 = arith.constant 0 : index
    %17 = vector.load %arg4[%c1, %c0_12] : memref<8x128xf32, #tpu.memory_space<vmem>>, vector<1x128xf32>
    %18 = vector.broadcast %17 : vector<1x128xf32> to vector<8x128xf32>
    %19 = arith.addf %16, %18 : vector<8x128xf32>
    %cst_13 = arith.constant 5.000000e-01 : f32
    %20 = vector.broadcast %cst_13 : f32 to vector<8x128xf32>
    %21 = arith.mulf %20, %19 : vector<8x128xf32>
    %22 = math.tanh %21 : vector<8x128xf32>
    %cst_14 = arith.constant 5.000000e-01 : f32
    %23 = vector.broadcast %cst_14 : f32 to vector<8x128xf32>
    %24 = arith.mulf %23, %22 : vector<8x128xf32>
    %cst_15 = arith.constant 5.000000e-01 : f32
    %25 = vector.broadcast %cst_15 : f32 to vector<8x128xf32>
    %26 = arith.addf %24, %25 : vector<8x128xf32>
    %c1_16 = arith.constant 1 : index
    %c0_17 = arith.constant 0 : index
    %c0_18 = arith.constant 0 : index
    %27 = vector.load %arg3[%c1_16, %c0_17, %c0_18] : memref<4x128x128xf32, #tpu.memory_space<vmem>>, vector<1x128x128xf32>
    %28 = vector.shape_cast %27 : vector<1x128x128xf32> to vector<128x128xf32>
    %cst_19 = arith.constant dense<0.000000e+00> : vector<8x128xf32>
    %29 = tpu.matmul %26, %28, %cst_19 {dimension_numbers = #tpu.dot_dimension_numbers<[1], [0], [0], [1], [0, 0, 1, 1], [], []>} : vector<8x128xf32>, vector<128x128xf32>, vector<8x128xf32> -> vector<8x128xf32>
    %c2 = arith.constant 2 : index
    %c0_20 = arith.constant 0 : index
    %30 = vector.load %arg4[%c2, %c0_20] : memref<8x128xf32, #tpu.memory_space<vmem>>, vector<1x128xf32>
    %31 = vector.broadcast %30 : vector<1x128xf32> to vector<8x128xf32>
    %32 = arith.addf %29, %31 : vector<8x128xf32>
    %cst_21 = arith.constant 5.000000e-01 : f32
    %33 = vector.broadcast %cst_21 : f32 to vector<8x128xf32>
    %34 = arith.mulf %33, %32 : vector<8x128xf32>
    %35 = math.tanh %34 : vector<8x128xf32>
    %cst_22 = arith.constant 5.000000e-01 : f32
    %36 = vector.broadcast %cst_22 : f32 to vector<8x128xf32>
    %37 = arith.mulf %36, %35 : vector<8x128xf32>
    %cst_23 = arith.constant 5.000000e-01 : f32
    %38 = vector.broadcast %cst_23 : f32 to vector<8x128xf32>
    %39 = arith.addf %37, %38 : vector<8x128xf32>
    %c2_24 = arith.constant 2 : index
    %c0_25 = arith.constant 0 : index
    %c0_26 = arith.constant 0 : index
    %40 = vector.load %arg3[%c2_24, %c0_25, %c0_26] : memref<4x128x128xf32, #tpu.memory_space<vmem>>, vector<1x128x128xf32>
    %41 = vector.shape_cast %40 : vector<1x128x128xf32> to vector<128x128xf32>
    %cst_27 = arith.constant dense<0.000000e+00> : vector<8x128xf32>
    %42 = tpu.matmul %39, %41, %cst_27 {dimension_numbers = #tpu.dot_dimension_numbers<[1], [0], [0], [1], [0, 0, 1, 1], [], []>} : vector<8x128xf32>, vector<128x128xf32>, vector<8x128xf32> -> vector<8x128xf32>
    %c3 = arith.constant 3 : index
    %c0_28 = arith.constant 0 : index
    %43 = vector.load %arg4[%c3, %c0_28] : memref<8x128xf32, #tpu.memory_space<vmem>>, vector<1x128xf32>
    %44 = vector.broadcast %43 : vector<1x128xf32> to vector<8x128xf32>
    %45 = arith.addf %42, %44 : vector<8x128xf32>
    %cst_29 = arith.constant 5.000000e-01 : f32
    %46 = vector.broadcast %cst_29 : f32 to vector<8x128xf32>
    %47 = arith.mulf %46, %45 : vector<8x128xf32>
    %48 = math.tanh %47 : vector<8x128xf32>
    %cst_30 = arith.constant 5.000000e-01 : f32
    %49 = vector.broadcast %cst_30 : f32 to vector<8x128xf32>
    %50 = arith.mulf %49, %48 : vector<8x128xf32>
    %cst_31 = arith.constant 5.000000e-01 : f32
    %51 = vector.broadcast %cst_31 : f32 to vector<8x128xf32>
    %52 = arith.addf %50, %51 : vector<8x128xf32>
    %c3_32 = arith.constant 3 : index
    %c0_33 = arith.constant 0 : index
    %c0_34 = arith.constant 0 : index
    %53 = vector.load %arg3[%c3_32, %c0_33, %c0_34] : memref<4x128x128xf32, #tpu.memory_space<vmem>>, vector<1x128x128xf32>
    %54 = vector.shape_cast %53 : vector<1x128x128xf32> to vector<128x128xf32>
    %cst_35 = arith.constant dense<0.000000e+00> : vector<8x128xf32>
    %55 = tpu.matmul %52, %54, %cst_35 {dimension_numbers = #tpu.dot_dimension_numbers<[1], [0], [0], [1], [0, 0, 1, 1], [], []>} : vector<8x128xf32>, vector<128x128xf32>, vector<8x128xf32> -> vector<8x128xf32>
    %c4 = arith.constant 4 : index
    %c0_36 = arith.constant 0 : index
    %56 = vector.load %arg4[%c4, %c0_36] : memref<8x128xf32, #tpu.memory_space<vmem>>, vector<1x128xf32>
    %57 = vector.broadcast %56 : vector<1x128xf32> to vector<8x128xf32>
    %58 = arith.addf %55, %57 : vector<8x128xf32>
    %c0_37 = arith.constant 0 : index
    %c0_38 = arith.constant 0 : index
    %59 = vector.load %arg5[%c0_37, %c0_38] : memref<8x128xf32, #tpu.memory_space<vmem>>, vector<8x128xf32>
    tpu.vector_store %arg5[%c0_37, %c0_38], %58 {strides = array<i32>} : memref<8x128xf32, #tpu.memory_space<vmem>>, vector<8x128xf32>,
    return
  }
  func.func @transform_0(%arg0: i32) -> (i32, i32) {
    %c0_i32 = arith.constant 0 : i32
    %c0_i32_0 = arith.constant 0 : i32
    return %arg0, %c0_i32 : i32, i32
  }
  func.func @transform_1(%arg0: i32) -> (i32, i32) {
    %c0_i32 = arith.constant 0 : i32
    %c0_i32_0 = arith.constant 0 : i32
    %c0_i32_1 = arith.constant 0 : i32
    return %c0_i32, %c0_i32_0 : i32, i32
  }
  func.func @transform_2(%arg0: i32) -> (i32, i32, i32) {
    %c0_i32 = arith.constant 0 : i32
    %c0_i32_0 = arith.constant 0 : i32
    %c0_i32_1 = arith.constant 0 : i32
    %c0_i32_2 = arith.constant 0 : i32
    return %c0_i32, %c0_i32_0, %c0_i32_1 : i32, i32, i32
  }
  func.func @transform_3(%arg0: i32) -> (i32, i32) {
    %c0_i32 = arith.constant 0 : i32
    %c0_i32_0 = arith.constant 0 : i32
    %c0_i32_1 = arith.constant 0 : i32
    return %c0_i32, %c0_i32_0 : i32, i32
  }
  func.func @transform_4(%arg0: i32) -> (i32, i32) {
    %c0_i32 = arith.constant 0 : i32
    %c0_i32_0 = arith.constant 0 : i32
    return %arg0, %c0_i32 : i32, i32
  }
}

</mosaic_0001>

<bundles_post_ra>
// kernel: tpu_custom_call.1
= control target key start
LH: loop header
LB: loop body
LE: loop exit
PB: predicated region body
PF: predicated region fallthrough
CT: control target
= control target key end

     0   :  { %9 = vsyncpa [#allocation3], 0  ;;  %s6496_s0 = inlined_call_operand.hbm [shape: f32[8,6144], index: 0, kind: input, shape index: {}]   ;;  %s6497_s1 = inlined_call_operand.hbm [shape: bf16[6144,128], index: 1, kind: input, shape index: {}]   ;;  %s6498_s2 = inlined_call_operand.hbm [shape: f32[4,128,128], index: 2, kind: input, shape index: {}]   ;;  %s6499_s3 = inlined_call_operand.hbm [shape: f32[8,128], index: 3, kind: input, shape index: {}]   ;;  %s6500_s4 = inlined_call_operand.hbm [shape: f32[8,128], index: 4, kind: output, shape index: {}]  }
   0x1   :  { %10 = vsyncpa [#allocation6], 0 }
   0x2   :  { %11 = vsyncpa [#allocation9], 0 }
   0x3   :  { %12 = vsyncpa [#allocation4], 0  ;;  %s6347_s15 = smov [#allocation5]   ;;  %s6229_s19 = scalar_lea.hbm %s6497_s1, 49152 }
   0x4   :  { %s28_s16 = sshll.u32 %s6347_s15, 4  ;;  %p6230_p0 = scmp.ne.s32.totalorder %s6497_s1, %s6229_s19  ;;  %s29_s16 = int_to_ptr.vmem [resolvable:$true] %s28_s16 }
   0x5   :  { %p6233_p1 = scmp.lt.u32.totalorder %s6229_s19, %s6497_s1 }
   0x7   :  { %p6235_p2 = pnand %p6233_p1, %p6230_p0 }
   0x9   :  { %6238 = shalt.err (!%p6235_p2)
}
   0xa   :  { %s6239_s24 = scalar_lea.vmem %s29_s16, 49152  ;;  %p6244_p4 = scmp.lt.s32.totalorder %s29_s16, %s29_s16 }
   0xb   :  { %p6240_p3 = scmp.ne.s32.totalorder %s29_s16, %s6239_s24  ;;  %p6245_p5 = scmp.lt.s32.totalorder %s6239_s24, %s6239_s24 }
   0xd   :  { %p6246_p6 = por %p6245_p5, %p6244_p4 }
   0xf   :  { %p6247_p7 = pnand %p6246_p6, %p6240_p3 }
  0x11   :  { %6250 = shalt.err (!%p6247_p7)
}
  0x12   :  { %s6348_s25 = smov 64   ;;  %s6349_s26 = smov 4  }
  0x13   :  { %34 = dma.hbm_to_vmem [thread:$0]  %s6497_s1, 49152, %s29_s16, [#allocation6], %s6348_s25, %s6348_s25, %s6349_s26  }
  0x14   :  { %s6350_s29 = smov [#allocation2]   ;;  %s6351_s5 = smov [#allocation7]  }
  0x15   :  { %s19_s30 = sshll.u32 %s6350_s29, 4  ;;  %s40_s6 = sshll.u32 %s6351_s5, 4  ;;  %s20_s30 = int_to_ptr.vmem [resolvable:$true] %s19_s30  ;;  %s41_s6 = int_to_ptr.vmem [resolvable:$true] %s40_s6 }
  0x16   :  { %s6251_s9 = scalar_lea.hbm %s6496_s0, 6144 }
  0x17   :  { %p6252_p8 = scmp.ne.s32.totalorder %s6496_s0, %s6251_s9  ;;  %p6255_p9 = scmp.lt.u32.totalorder %s6251_s9, %s6496_s0 }
  0x19   :  { %p6257_p10 = pnand %p6255_p9, %p6252_p8 }
  0x1b   :  { %6260 = shalt.err (!%p6257_p10)
}
  0x1c   :  { %s6261_s1 = scalar_lea.vmem %s20_s30, 6144  ;;  %p6266_p12 = scmp.lt.s32.totalorder %s20_s30, %s20_s30 }
  0x1d   :  { %p6262_p11 = scmp.ne.s32.totalorder %s20_s30, %s6261_s1  ;;  %p6267_p13 = scmp.lt.s32.totalorder %s6261_s1, %s6261_s1 }
  0x1f   :  { %p6268_p0 = por %p6267_p13, %p6266_p12 }
  0x21   :  { %p6269_p1 = pnand %p6268_p0, %p6262_p11 }
  0x23   :  { %6272 = shalt.err (!%p6269_p1)
}
  0x24   :  { %22 = dma.hbm_to_vmem [thread:$0]  %s6496_s0, 6144, %s20_s30, [#allocation3]  }
  0x25   :  { %s6273_s18 = scalar_lea.hbm %s6498_s2, 8192 }
  0x26   :  { %p6274_p2 = scmp.ne.s32.totalorder %s6498_s2, %s6273_s18  ;;  %p6277_p3 = scmp.lt.u32.totalorder %s6273_s18, %s6498_s2 }
  0x28   :  { %p6279_p4 = pnand %p6277_p3, %p6274_p2 }
  0x2a   :  { %6282 = shalt.err (!%p6279_p4)
}
  0x2b   :  { %s6283_s23 = scalar_lea.vmem %s41_s6, 8192  ;;  %p6288_p6 = scmp.lt.s32.totalorder %s41_s6, %s41_s6 }
  0x2c   :  { %p6284_p5 = scmp.ne.s32.totalorder %s41_s6, %s6283_s23  ;;  %p6289_p7 = scmp.lt.s32.totalorder %s6283_s23, %s6283_s23 }
  0x2e   :  { %p6290_p8 = por %p6289_p7, %p6288_p6 }
  0x30   :  { %p6291_p9 = pnand %p6290_p8, %p6284_p5 }
  0x32   :  { %6294 = shalt.err (!%p6291_p9)
}
  0x33   :  { %s6352_s0 = smov 128   ;;  %s6353_s24 = smov 8  }
  0x34   :  { %46 = dma.hbm_to_vmem [thread:$0]  %s6498_s2, 8192, %s41_s6, [#allocation6], %s6352_s0, %s6352_s0, %s6353_s24  }
  0x35   :  { %s6354_s27 = smov [#allocation8]   ;;  %s6295_s5 = scalar_lea.hbm %s6499_s3, 128 }
  0x36   :  { %s53_s28 = sshll.u32 %s6354_s27, 4  ;;  %p6296_p10 = scmp.ne.s32.totalorder %s6499_s3, %s6295_s5  ;;  %s54_s28 = int_to_ptr.vmem [resolvable:$true] %s53_s28 }
  0x37   :  { %p6299_p11 = scmp.lt.u32.totalorder %s6295_s5, %s6499_s3 }
  0x39   :  { %p6301_p12 = pnand %p6299_p11, %p6296_p10 }
  0x3b   :  { %6304 = shalt.err (!%p6301_p12)
}
  0x3c   :  { %s6305_s11 = scalar_lea.vmem %s54_s28, 128  ;;  %p6310_p0 = scmp.lt.s32.totalorder %s54_s28, %s54_s28 }
  0x3d   :  { %p6306_p13 = scmp.ne.s32.totalorder %s54_s28, %s6305_s11  ;;  %p6311_p1 = scmp.lt.s32.totalorder %s6305_s11, %s6305_s11 }
  0x3f   :  { %p6312_p2 = por %p6311_p1, %p6310_p0 }
  0x41   :  { %p6313_p3 = pnand %p6312_p2, %p6306_p13 }
  0x43   :  { %6316 = shalt.err (!%p6313_p3)
}
  0x44   :  { %56 = dma.hbm_to_vmem [thread:$0]  %s6499_s3, 128, %s54_s28, [#allocation9]  }
  0x45   :  { %6339 = dma.done.wait [#allocation3], 6144  }
  0x46   :  { %6340 = vsyncadd [#allocation3], 4294961152 }
  0x47   :  { %6341 = dma.done.wait [#allocation6], 57344  }
  0x48   :  { %6342 = vsyncadd [#allocation6], 4294909952 }
  0x49   :  { %6343 = dma.done.wait [#allocation9], 128  }
  0x4a   :  { %6344 = vsyncadd [#allocation9], 4294967168  ;;  %v5837_v0 = vld [vmem:[#allocation5 + $0x40] sm:$0xff]   ;;  %v5841_v4 = vld [vmem:[#allocation5 + $0x48] sm:$0xff]   ;;  %vm6356_vm0 = vmmov 0   ;;  %s6358_s3 = smov [#allocation10]  }
  0x4b   :  { %v5838_v1 = vld [vmem:[#allocation5 + $0xc0] sm:$0xff]   ;;  %4993 = vmatprep.subr.bf16.mxu0 %v5837_v0  ;;  %v5842_v5 = vld [vmem:[#allocation5 + $0xc8] sm:$0xff]   ;;  %v5845_v8 = vld [vmem:[#allocation5 + $0x50] sm:$0xff]   ;;  %s4593_s12 = sshll.u32 %s6358_s3, 4  ;;  %s4594_s12 = int_to_ptr.vmem [resolvable:$true] %s4593_s12 }
  0x4c   :  { %v5839_v2 = vld [vmem:[#allocation5] sm:$0xff]   ;;  %5015 = vmatprep.subr.bf16.mxu1 %v5838_v1  ;;  %v5843_v6 = vld [vmem:[#allocation5 + $0x8] sm:$0xff]   ;;  %v5846_v9 = vld [vmem:[#allocation5 + $0xd0] sm:$0xff]   ;;  %s6317_s13 = scalar_lea.vmem %s4594_s12, 128  ;;  %p6322_p5 = scmp.lt.s32.totalorder %s4594_s12, %s4594_s12 }
  0x4d   :  { %v5840_v3 = vld [vmem:[#allocation5 + $0x80] sm:$0xff]   ;;  %4994 = vmatpush3.bf16.msra.mxu0 %v5839_v2  ;;  %v5844_v7 = vld [vmem:[#allocation5 + $0x88] sm:$0xff]   ;;  %v5847_v10 = vld [vmem:[#allocation5 + $0x10] sm:$0xff]   ;;  %p6318_p4 = scmp.ne.s32.totalorder %s4594_s12, %s6317_s13  ;;  %p6323_p6 = scmp.lt.s32.totalorder %s6317_s13, %s6317_s13 }
  0x4e   :  { %5016 = vmatpush3.bf16.msra.mxu1 %v5840_v3  ;;  %4995 = vmatprep.subr.bf16.mxu0 %v5841_v4  ;;  %v5848_v11 = vld [vmem:[#allocation5 + $0x90] sm:$0xff]   ;;  %v5849_v12 = vld [vmem:[#allocation5 + $0x58] sm:$0xff]   ;;  %v5853_v16 = vld [vmem:[#allocation5 + $0x60] sm:$0xff]  }
  0x4f   :  { %5017 = vmatprep.subr.bf16.mxu1 %v5842_v5  ;;  %v5850_v13 = vld [vmem:[#allocation5 + $0xd8] sm:$0xff]   ;;  %v5854_v17 = vld [vmem:[#allocation5 + $0xe0] sm:$0xff]   ;;  %v5857_v20 = vld [vmem:[#allocation5 + $0x68] sm:$0xff]   ;;  %p6324_p7 = por %p6323_p6, %p6322_p5 }
  0x50   :  { %v5851_v14 = vld [vmem:[#allocation5 + $0x18] sm:$0xff]   ;;  %v5855_v18 = vld [vmem:[#allocation5 + $0x20] sm:$0xff]   ;;  %v5858_v21 = vld [vmem:[#allocation5 + $0xe8] sm:$0xff]  }
  0x51   :  { %4996 = vmatpush3.bf16.msra.mxu0 %v5843_v6  ;;  %v5852_v15 = vld [vmem:[#allocation5 + $0x98] sm:$0xff]   ;;  %v5856_v19 = vld [vmem:[#allocation5 + $0xa0] sm:$0xff]   ;;  %v5859_v22 = vld [vmem:[#allocation5 + $0x28] sm:$0xff]   ;;  %p6325_p8 = pnand %p6324_p7, %p6318_p4 }
  0x52   :  { %5018 = vmatpush3.bf16.msra.mxu1 %v5844_v7  ;;  %4997 = vmatprep.subr.bf16.mxu0 %v5845_v8  ;;  %v5860_v23 = vld [vmem:[#allocation5 + $0xa8] sm:$0xff]   ;;  %v5861_v24 = vld [vmem:[#allocation5 + $0x70] sm:$0xff]   ;;  %v5865_v28 = vld [vmem:[#allocation5 + $0x78] sm:$0xff]  }
  0x53   :  { %5019 = vmatprep.subr.bf16.mxu1 %v5846_v9  ;;  %v5862_v25 = vld [vmem:[#allocation5 + $0xf0] sm:$0xff]   ;;  %v5866_v29 = vld [vmem:[#allocation5 + $0xf8] sm:$0xff]   ;;  %v71_v32 = vld [vmem:[#allocation2 + $0x8] sm:$0xff] }
  0x54   :  { %v5863_v26 = vld [vmem:[#allocation5 + $0x30] sm:$0xff]   ;;  %v5867_v30 = vld [vmem:[#allocation5 + $0x38] sm:$0xff]   ;;  %v70_v34 = vld [vmem:[#allocation2] sm:$0xff]  ;;  %v119_v35 = vpack.c.bf16 %v71_v32, %v71_v32 }
  0x55   :  { %4998 = vmatpush3.bf16.msra.mxu0 %v5847_v10  ;;  %v5864_v27 = vld [vmem:[#allocation5 + $0xb0] sm:$0xff]   ;;  %v5868_v31 = vld [vmem:[#allocation5 + $0xb8] sm:$0xff]   ;;  %v118_v37 = vpack.c.bf16 %v70_v34, %v70_v34  ;;  %v5869_v40 = vld [vmem:[#allocation5 + $0x140] sm:$0xff]  }
  0x56   :  { %5020 = vmatpush3.bf16.msra.mxu1 %v5848_v11  ;;  %4999 = vmatprep.subr.bf16.mxu0 %v5849_v12  ;;  %v73_v33 = vld [vmem:[#allocation2 + $0x18] sm:$0xff]  ;;  %v72_v38 = vld [vmem:[#allocation2 + $0x10] sm:$0xff]  ;;  %v5870_v41 = vld [vmem:[#allocation5 + $0x1c0] sm:$0xff]  }
  0x57   :  { %5021 = vmatprep.subr.bf16.mxu1 %v5850_v13  ;;  %v121_v36 = vpack.c.bf16 %v73_v33, %v73_v33  ;;  %v120_v39 = vpack.c.bf16 %v72_v38, %v72_v38  ;;  %3275 = vmatprep.mubr.bf16.mxu0 %v119_v35  ;;  %v5871_v42 = vld [vmem:[#allocation5 + $0x100] sm:$0xff]   ;;  %v5873_v44 = vld [vmem:[#allocation5 + $0x148] sm:$0xff]   ;;  %v5877_v48 = vld [vmem:[#allocation5 + $0x150] sm:$0xff]  }
  0x58   :  { %v5872_v43 = vld [vmem:[#allocation5 + $0x180] sm:$0xff]   ;;  %v5874_v45 = vld [vmem:[#allocation5 + $0x1c8] sm:$0xff]   ;;  %v5878_v49 = vld [vmem:[#allocation5 + $0x1d0] sm:$0xff]  }
  0x59   :  { %5000 = vmatpush3.bf16.msra.mxu0 %v5851_v14  ;;  %3315 = vmatprep.mubr.bf16.mxu1 %v121_v36  ;;  %v5875_v46 = vld [vmem:[#allocation5 + $0x108] sm:$0xff]   ;;  %v5879_v50 = vld [vmem:[#allocation5 + $0x110] sm:$0xff]   ;;  %v5881_v52 = vld [vmem:[#allocation5 + $0x158] sm:$0xff]  }
  0x5a   :  { %5022 = vmatpush3.bf16.msra.mxu1 %v5852_v15  ;;  %5001 = vmatprep.subr.bf16.mxu0 %v5853_v16  ;;  %v5876_v47 = vld [vmem:[#allocation5 + $0x188] sm:$0xff]   ;;  %v5880_v51 = vld [vmem:[#allocation5 + $0x190] sm:$0xff]   ;;  %v5882_v53 = vld [vmem:[#allocation5 + $0x1d8] sm:$0xff]  }
  0x5b   :  { %5023 = vmatprep.subr.bf16.mxu1 %v5854_v17  ;;  %v5883_v54 = vld [vmem:[#allocation5 + $0x118] sm:$0xff]   ;;  %v5885_v56 = vld [vmem:[#allocation5 + $0x160] sm:$0xff]   ;;  %v5889_v60 = vld [vmem:[#allocation5 + $0x168] sm:$0xff]  }
  0x5c   :  { %v5884_v55 = vld [vmem:[#allocation5 + $0x198] sm:$0xff]   ;;  %v5886_v57 = vld [vmem:[#allocation5 + $0x1e0] sm:$0xff]   ;;  %v5890_v61 = vld [vmem:[#allocation5 + $0x1e8] sm:$0xff]  }
  0x5d   :  { %5002 = vmatpush3.bf16.msra.mxu0 %v5855_v18  ;;  %v5887_v58 = vld [vmem:[#allocation5 + $0x120] sm:$0xff]   ;;  %v5891_v62 = vld [vmem:[#allocation5 + $0x128] sm:$0xff]   ;;  %v5893_v0 = vld [vmem:[#allocation5 + $0x170] sm:$0xff]  }
  0x5e   :  { %5024 = vmatpush3.bf16.msra.mxu1 %v5856_v19  ;;  %5003 = vmatprep.subr.bf16.mxu0 %v5857_v20  ;;  %v5888_v59 = vld [vmem:[#allocation5 + $0x1a0] sm:$0xff]   ;;  %v5892_v63 = vld [vmem:[#allocation5 + $0x1a8] sm:$0xff]   ;;  %v5894_v1 = vld [vmem:[#allocation5 + $0x1f0] sm:$0xff]  }
  0x5f   :  { %5025 = vmatprep.subr.bf16.mxu1 %v5858_v21  ;;  %v5895_v2 = vld [vmem:[#allocation5 + $0x130] sm:$0xff]   ;;  %v5897_v4 = vld [vmem:[#allocation5 + $0x178] sm:$0xff]   ;;  %v75_v8 = vld [vmem:[#allocation2 + $0x28] sm:$0xff] }
  0x60   :  { %v5896_v3 = vld [vmem:[#allocation5 + $0x1b0] sm:$0xff]   ;;  %v5898_v5 = vld [vmem:[#allocation5 + $0x1f8] sm:$0xff]   ;;  %v123_v10 = vpack.c.bf16 %v75_v8, %v75_v8  ;;  %v74_v12 = vld [vmem:[#allocation2 + $0x20] sm:$0xff] }
  0x61   :  { %5004 = vmatpush3.bf16.msra.mxu0 %v5859_v22  ;;  %v5899_v6 = vld [vmem:[#allocation5 + $0x138] sm:$0xff]   ;;  %v76_v13 = vld [vmem:[#allocation2 + $0x30] sm:$0xff]  ;;  %v122_v14 = vpack.c.bf16 %v74_v12, %v74_v12  ;;  %v5901_v16 = vld [vmem:[#allocation5 + $0x240] sm:$0xff]  }
  0x62   :  { %5026 = vmatpush3.bf16.msra.mxu1 %v5860_v23  ;;  %5005 = vmatprep.subr.bf16.mxu0 %v5861_v24  ;;  %v5900_v7 = vld [vmem:[#allocation5 + $0x1b8] sm:$0xff]   ;;  %v124_v15 = vpack.c.bf16 %v76_v13, %v76_v13  ;;  %v5902_v17 = vld [vmem:[#allocation5 + $0x2c0] sm:$0xff]   ;;  %v5905_v20 = vld [vmem:[#allocation5 + $0x248] sm:$0xff]  }
  0x63   :  { %5027 = vmatprep.subr.bf16.mxu1 %v5862_v25  ;;  %v77_v9 = vld [vmem:[#allocation2 + $0x38] sm:$0xff]  ;;  %v5903_v18 = vld [vmem:[#allocation5 + $0x200] sm:$0xff]   ;;  %v5906_v21 = vld [vmem:[#allocation5 + $0x2c8] sm:$0xff]  }
  0x64   :  { %v125_v11 = vpack.c.bf16 %v77_v9, %v77_v9  ;;  %v5904_v19 = vld [vmem:[#allocation5 + $0x280] sm:$0xff]   ;;  %v5907_v22 = vld [vmem:[#allocation5 + $0x208] sm:$0xff]   ;;  %v5909_v24 = vld [vmem:[#allocation5 + $0x250] sm:$0xff]  }
  0x65   :  { %5006 = vmatpush3.bf16.msra.mxu0 %v5863_v26  ;;  %v5908_v23 = vld [vmem:[#allocation5 + $0x288] sm:$0xff]   ;;  %v5910_v25 = vld [vmem:[#allocation5 + $0x2d0] sm:$0xff]   ;;  %v5917_v32 = vld [vmem:[#allocation5 + $0x260] sm:$0xff]  }
  0x66   :  { %5028 = vmatpush3.bf16.msra.mxu1 %v5864_v27  ;;  %5007 = vmatprep.subr.bf16.mxu0 %v5865_v28  ;;  %v5911_v26 = vld [vmem:[#allocation5 + $0x210] sm:$0xff]   ;;  %v5913_v28 = vld [vmem:[#allocation5 + $0x258] sm:$0xff]   ;;  %v5918_v33 = vld [vmem:[#allocation5 + $0x2e0] sm:$0xff]  }
  0x67   :  { %5029 = vmatprep.subr.bf16.mxu1 %v5866_v29  ;;  %v5912_v27 = vld [vmem:[#allocation5 + $0x290] sm:$0xff]   ;;  %v5914_v29 = vld [vmem:[#allocation5 + $0x2d8] sm:$0xff]   ;;  %v5919_v34 = vld [vmem:[#allocation5 + $0x220] sm:$0xff]  }
  0x68   :  { %v5920_v35 = vld [vmem:[#allocation5 + $0x2a0] sm:$0xff]   ;;  %v5921_v36 = vld [vmem:[#allocation5 + $0x268] sm:$0xff]  }
  0x69   :  { %5008 = vmatpush3.bf16.msra.mxu0 %v5867_v30  ;;  %v5915_v30 = vld [vmem:[#allocation5 + $0x218] sm:$0xff]   ;;  %v5923_v38 = vld [vmem:[#allocation5 + $0x228] sm:$0xff]   ;;  %v5949_v8 = vld [vmem:[#allocation5 + $0x360] sm:$0xff]  }
  0x6a   :  { %5030 = vmatpush3.bf16.msra.mxu1 %v5868_v31  ;;  %5037 = vmatprep.subr.bf16.mxu0 %v5869_v40  ;;  %v5916_v31 = vld [vmem:[#allocation5 + $0x298] sm:$0xff]   ;;  %v5925_v40 = vld [vmem:[#allocation5 + $0x270] sm:$0xff]   ;;  %v5950_v9 = vld [vmem:[#allocation5 + $0x3e0] sm:$0xff]  }
  0x6b   :  { %5059 = vmatprep.subr.bf16.mxu1 %v5870_v41  ;;  %v5926_v41 = vld [vmem:[#allocation5 + $0x2f0] sm:$0xff]   ;;  %v5953_v12 = vld [vmem:[#allocation5 + $0x368] sm:$0xff]  }
  0x6c   :  { %3276 = vmatmul.mubr.bf16.vlgmr.msra.gmra.mrb[0].mxu0 %v118_v37  ;;  %v5922_v37 = vld [vmem:[#allocation5 + $0x2e8] sm:$0xff]  }
  0x6d   :  { %3316 = vmatmul.mubr.bf16.vlgmr.msra.gmra.mrb[0].mxu1 %v120_v39  ;;  %5038 = vmatpush3.bf16.msra.mxu0 %v5871_v42  ;;  %v5924_v39 = vld [vmem:[#allocation5 + $0x2a8] sm:$0xff]   ;;  %v5927_v42 = vld [vmem:[#allocation5 + $0x230] sm:$0xff]  }
  0x6e   :  { %5060 = vmatpush3.bf16.msra.mxu1 %v5872_v43  ;;  %5039 = vmatprep.subr.bf16.mxu0 %v5873_v44  ;;  %v5928_v43 = vld [vmem:[#allocation5 + $0x2b0] sm:$0xff]   ;;  %v5929_v44 = vld [vmem:[#allocation5 + $0x278] sm:$0xff]   ;;  %v5954_v13 = vld [vmem:[#allocation5 + $0x3e8] sm:$0xff]  }
  0x6f   :  { %5061 = vmatprep.subr.bf16.mxu1 %v5874_v45  ;;  %3355 = vmatprep.mubr.bf16.mxu0 %v123_v10  ;;  %v5930_v45 = vld [vmem:[#allocation5 + $0x2f8] sm:$0xff]   ;;  %v5951_v10 = vld [vmem:[#allocation5 + $0x320] sm:$0xff]  }
  0x70   :  { %3395 = vmatprep.mubr.bf16.mxu1 %v125_v11  ;;  %v5952_v11 = vld [vmem:[#allocation5 + $0x3a0] sm:$0xff]  }
  0x71   :  { %5040 = vmatpush3.bf16.msra.mxu0 %v5875_v46  ;;  %v5931_v46 = vld [vmem:[#allocation5 + $0x238] sm:$0xff]  }
  0x72   :  { %5062 = vmatpush3.bf16.msra.mxu1 %v5876_v47  ;;  %5041 = vmatprep.subr.bf16.mxu0 %v5877_v48  ;;  %v5932_v47 = vld [vmem:[#allocation5 + $0x2b8] sm:$0xff]   ;;  %v79_v48 = vld [vmem:[#allocation2 + $0x48] sm:$0xff] }
  0x73   :  { %5063 = vmatprep.subr.bf16.mxu1 %v5878_v49  ;;  %v127_v49 = vpack.c.bf16 %v79_v48, %v79_v48  ;;  %v5981_v48 = vld [vmem:[#allocation5 + $0x460] sm:$0xff]  }
  0x75   :  { %5042 = vmatpush3.bf16.msra.mxu0 %v5879_v50  ;;  %v81_v50 = vld [vmem:[#allocation2 + $0x58] sm:$0xff] }
  0x76   :  { %5064 = vmatpush3.bf16.msra.mxu1 %v5880_v51  ;;  %5043 = vmatprep.subr.bf16.mxu0 %v5881_v52  ;;  %v78_v51 = vld [vmem:[#allocation2 + $0x40] sm:$0xff]  ;;  %v80_v52 = vld [vmem:[#allocation2 + $0x50] sm:$0xff] }
  0x77   :  { %5065 = vmatprep.subr.bf16.mxu1 %v5882_v53  ;;  %v129_v53 = vpack.c.bf16 %v81_v50, %v81_v50  ;;  %v5983_v50 = vld [vmem:[#allocation5 + $0x420] sm:$0xff]  }
  0x79   :  { %5044 = vmatpush3.bf16.msra.mxu0 %v5883_v54  ;;  %v126_v54 = vpack.c.bf16 %v78_v51, %v78_v51  ;;  %v5984_v51 = vld [vmem:[#allocation5 + $0x4a0] sm:$0xff]  }
  0x7a   :  { %5066 = vmatpush3.bf16.msra.mxu1 %v5884_v55  ;;  %5045 = vmatprep.subr.bf16.mxu0 %v5885_v56  ;;  %v128_v55 = vpack.c.bf16 %v80_v52, %v80_v52  ;;  %v5933_v56 = vld [vmem:[#allocation5 + $0x340] sm:$0xff]   ;;  %v5985_v52 = vld [vmem:[#allocation5 + $0x468] sm:$0xff]  }
  0x7b   :  { %5067 = vmatprep.subr.bf16.mxu1 %v5886_v57  ;;  %v5934_v57 = vld [vmem:[#allocation5 + $0x3c0] sm:$0xff]  }
  0x7d   :  { %5046 = vmatpush3.bf16.msra.mxu0 %v5887_v58  ;;  %v5935_v58 = vld [vmem:[#allocation5 + $0x300] sm:$0xff]  }
  0x7e   :  { %5068 = vmatpush3.bf16.msra.mxu1 %v5888_v59  ;;  %5047 = vmatprep.subr.bf16.mxu0 %v5889_v60  ;;  %v5936_v59 = vld [vmem:[#allocation5 + $0x380] sm:$0xff]   ;;  %v5937_v60 = vld [vmem:[#allocation5 + $0x348] sm:$0xff]  }
  0x7f   :  { %5069 = vmatprep.subr.bf16.mxu1 %v5890_v61  ;;  %v5938_v61 = vld [vmem:[#allocation5 + $0x3c8] sm:$0xff]  }
  0x81   :  { %5048 = vmatpush3.bf16.msra.mxu0 %v5891_v62  ;;  %v5939_v62 = vld [vmem:[#allocation5 + $0x308] sm:$0xff]  }
  0x82   :  { %5070 = vmatpush3.bf16.msra.mxu1 %v5892_v63  ;;  %5049 = vmatprep.subr.bf16.mxu0 %v5893_v0  ;;  %v5940_v63 = vld [vmem:[#allocation5 + $0x388] sm:$0xff]   ;;  %v5941_v0 = vld [vmem:[#allocation5 + $0x350] sm:$0xff]  }
  0x83   :  { %5071 = vmatprep.subr.bf16.mxu1 %v5894_v1  ;;  %v5942_v1 = vld [vmem:[#allocation5 + $0x3d0] sm:$0xff]  }
  0x85   :  { %5050 = vmatpush3.bf16.msra.mxu0 %v5895_v2  ;;  %v5943_v2 = vld [vmem:[#allocation5 + $0x310] sm:$0xff]  }
  0x86   :  { %5072 = vmatpush3.bf16.msra.mxu1 %v5896_v3  ;;  %5051 = vmatprep.subr.bf16.mxu0 %v5897_v4  ;;  %v5944_v3 = vld [vmem:[#allocation5 + $0x390] sm:$0xff]   ;;  %v5945_v4 = vld [vmem:[#allocation5 + $0x358] sm:$0xff]  }
  0x87   :  { %5073 = vmatprep.subr.bf16.mxu1 %v5898_v5  ;;  %v5946_v5 = vld [vmem:[#allocation5 + $0x3d8] sm:$0xff]  }
  0x89   :  { %5052 = vmatpush3.bf16.msra.mxu0 %v5899_v6  ;;  %v5947_v6 = vld [vmem:[#allocation5 + $0x318] sm:$0xff]  }
  0x8a   :  { %5074 = vmatpush3.bf16.msra.mxu1 %v5900_v7  ;;  %5081 = vmatprep.subr.bf16.mxu0 %v5901_v16  ;;  %v5948_v7 = vld [vmem:[#allocation5 + $0x398] sm:$0xff]   ;;  %v5957_v16 = vld [vmem:[#allocation5 + $0x370] sm:$0xff]  }
  0x8b   :  { %5103 = vmatprep.subr.bf16.mxu1 %v5902_v17  ;;  %v5958_v17 = vld [vmem:[#allocation5 + $0x3f0] sm:$0xff]  }
  0x8c   :  { %3356 = vmatmul.mubr.bf16.vlgmr.msra.gmra.mrb[4].mxu0 %v122_v14  ;;  %v5955_v14 = vld [vmem:[#allocation5 + $0x328] sm:$0xff]  }
  0x8d   :  { %3396 = vmatmul.mubr.bf16.vlgmr.msra.gmra.mrb[4].mxu1 %v124_v15  ;;  %5082 = vmatpush3.bf16.msra.mxu0 %v5903_v18  ;;  %v5956_v15 = vld [vmem:[#allocation5 + $0x3a8] sm:$0xff]   ;;  %v5959_v18 = vld [vmem:[#allocation5 + $0x330] sm:$0xff]  }
  0x8e   :  { %5104 = vmatpush3.bf16.msra.mxu1 %v5904_v19  ;;  %5083 = vmatprep.subr.bf16.mxu0 %v5905_v20  ;;  %v5960_v19 = vld [vmem:[#allocation5 + $0x3b0] sm:$0xff]   ;;  %v5961_v20 = vld [vmem:[#allocation5 + $0x378] sm:$0xff]  }
  0x8f   :  { %5105 = vmatprep.subr.bf16.mxu1 %v5906_v21  ;;  %3435 = vmatprep.mubr.bf16.mxu0 %v127_v49  ;;  %v5962_v21 = vld [vmem:[#allocation5 + $0x3f8] sm:$0xff]   ;;  %v5982_v49 = vld [vmem:[#allocation5 + $0x4e0] sm:$0xff]  }
  0x90   :  { %3475 = vmatprep.mubr.bf16.mxu1 %v129_v53  ;;  %v5986_v53 = vld [vmem:[#allocation5 + $0x4e8] sm:$0xff]  }
  0x91   :  { %5084 = vmatpush3.bf16.msra.mxu0 %v5907_v22  ;;  %v5963_v22 = vld [vmem:[#allocation5 + $0x338] sm:$0xff]  }
  0x92   :  { %5106 = vmatpush3.bf16.msra.mxu1 %v5908_v23  ;;  %5085 = vmatprep.subr.bf16.mxu0 %v5909_v24  ;;  %v5964_v23 = vld [vmem:[#allocation5 + $0x3b8] sm:$0xff]   ;;  %v83_v24 = vld [vmem:[#allocation2 + $0x68] sm:$0xff] }
  0x93   :  { %5107 = vmatprep.subr.bf16.mxu1 %v5910_v25  ;;  %v85_v25 = vld [vmem:[#allocation2 + $0x78] sm:$0xff] }
  0x95   :  { %5086 = vmatpush3.bf16.msra.mxu0 %v5911_v26  ;;  %v82_v26 = vld [vmem:[#allocation2 + $0x60] sm:$0xff] }
  0x96   :  { %5108 = vmatpush3.bf16.msra.mxu1 %v5912_v27  ;;  %5087 = vmatprep.subr.bf16.mxu0 %v5913_v28  ;;  %v131_v27 = vpack.c.bf16 %v83_v24, %v83_v24  ;;  %v133_v28 = vpack.c.bf16 %v85_v25, %v85_v25  ;;  %v6013_v24 = vld [vmem:[#allocation5 + $0x560] sm:$0xff]  }
  0x97   :  { %5109 = vmatprep.subr.bf16.mxu1 %v5914_v29  ;;  %v130_v29 = vpack.c.bf16 %v82_v26, %v82_v26  ;;  %v6014_v25 = vld [vmem:[#allocation5 + $0x5e0] sm:$0xff]  }
  0x98   :  { %v6015_v26 = vld [vmem:[#allocation5 + $0x520] sm:$0xff]  }
  0x99   :  { %5088 = vmatpush3.bf16.msra.mxu0 %v5915_v30  ;;  %v84_v30 = vld [vmem:[#allocation2 + $0x70] sm:$0xff] }
  0x9a   :  { %5110 = vmatpush3.bf16.msra.mxu1 %v5916_v31  ;;  %5089 = vmatprep.subr.bf16.mxu0 %v5917_v32  ;;  %v132_v31 = vpack.c.bf16 %v84_v30, %v84_v30  ;;  %v5965_v32 = vld [vmem:[#allocation5 + $0x440] sm:$0xff]   ;;  %v6019_v30 = vld [vmem:[#allocation5 + $0x528] sm:$0xff]  }
  0x9b   :  { %5111 = vmatprep.subr.bf16.mxu1 %v5918_v33  ;;  %v5966_v33 = vld [vmem:[#allocation5 + $0x4c0] sm:$0xff]  }
  0x9d   :  { %5090 = vmatpush3.bf16.msra.mxu0 %v5919_v34  ;;  %v5967_v34 = vld [vmem:[#allocation5 + $0x400] sm:$0xff]  }
  0x9e   :  { %5112 = vmatpush3.bf16.msra.mxu1 %v5920_v35  ;;  %5091 = vmatprep.subr.bf16.mxu0 %v5921_v36  ;;  %v5968_v35 = vld [vmem:[#allocation5 + $0x480] sm:$0xff]   ;;  %v5969_v36 = vld [vmem:[#allocation5 + $0x448] sm:$0xff]  }
  0x9f   :  { %5113 = vmatprep.subr.bf16.mxu1 %v5922_v37  ;;  %v5970_v37 = vld [vmem:[#allocation5 + $0x4c8] sm:$0xff]  }
  0xa1   :  { %5092 = vmatpush3.bf16.msra.mxu0 %v5923_v38  ;;  %v5971_v38 = vld [vmem:[#allocation5 + $0x408] sm:$0xff]  }
  0xa2   :  { %5114 = vmatpush3.bf16.msra.mxu1 %v5924_v39  ;;  %5093 = vmatprep.subr.bf16.mxu0 %v5925_v40  ;;  %v5972_v39 = vld [vmem:[#allocation5 + $0x488] sm:$0xff]   ;;  %v5973_v40 = vld [vmem:[#allocation5 + $0x450] sm:$0xff]  }
  0xa3   :  { %5115 = vmatprep.subr.bf16.mxu1 %v5926_v41  ;;  %v5974_v41 = vld [vmem:[#allocation5 + $0x4d0] sm:$0xff]  }
  0xa5   :  { %5094 = vmatpush3.bf16.msra.mxu0 %v5927_v42  ;;  %v5975_v42 = vld [vmem:[#allocation5 + $0x410] sm:$0xff]  }
  0xa6   :  { %5116 = vmatpush3.bf16.msra.mxu1 %v5928_v43  ;;  %5095 = vmatprep.subr.bf16.mxu0 %v5929_v44  ;;  %v5976_v43 = vld [vmem:[#allocation5 + $0x490] sm:$0xff]   ;;  %v5977_v44 = vld [vmem:[#allocation5 + $0x458] sm:$0xff]  }
  0xa7   :  { %5117 = vmatprep.subr.bf16.mxu1 %v5930_v45  ;;  %v5978_v45 = vld [vmem:[#allocation5 + $0x4d8] sm:$0xff]  }
  0xa9   :  { %5096 = vmatpush3.bf16.msra.mxu0 %v5931_v46  ;;  %v5979_v46 = vld [vmem:[#allocation5 + $0x418] sm:$0xff]  }
  0xaa   :  { %5118 = vmatpush3.bf16.msra.mxu1 %v5932_v47  ;;  %5125 = vmatprep.subr.bf16.mxu0 %v5933_v56  ;;  %v5980_v47 = vld [vmem:[#allocation5 + $0x498] sm:$0xff]   ;;  %v5989_v56 = vld [vmem:[#allocation5 + $0x470] sm:$0xff]  }
  0xab   :  { %5147 = vmatprep.subr.bf16.mxu1 %v5934_v57  ;;  %v5990_v57 = vld [vmem:[#allocation5 + $0x4f0] sm:$0xff]  }
  0xac   :  { %3436 = vmatmul.mubr.bf16.vlgmr.msra.gmra.mrb[8].mxu0 %v126_v54  ;;  %v5987_v54 = vld [vmem:[#allocation5 + $0x428] sm:$0xff]  }
  0xad   :  { %3476 = vmatmul.mubr.bf16.vlgmr.msra.gmra.mrb[8].mxu1 %v128_v55  ;;  %5126 = vmatpush3.bf16.msra.mxu0 %v5935_v58  ;;  %v5988_v55 = vld [vmem:[#allocation5 + $0x4a8] sm:$0xff]   ;;  %v5991_v58 = vld [vmem:[#allocation5 + $0x430] sm:$0xff]  }
  0xae   :  { %5148 = vmatpush3.bf16.msra.mxu1 %v5936_v59  ;;  %5127 = vmatprep.subr.bf16.mxu0 %v5937_v60  ;;  %v5992_v59 = vld [vmem:[#allocation5 + $0x4b0] sm:$0xff]   ;;  %v5993_v60 = vld [vmem:[#allocation5 + $0x478] sm:$0xff]  }
  0xaf   :  { %5149 = vmatprep.subr.bf16.mxu1 %v5938_v61  ;;  %3515 = vmatprep.mubr.bf16.mxu0 %v131_v27  ;;  %v5994_v61 = vld [vmem:[#allocation5 + $0x4f8] sm:$0xff]   ;;  %v6016_v27 = vld [vmem:[#allocation5 + $0x5a0] sm:$0xff]  }
  0xb0   :  { %3555 = vmatprep.mubr.bf16.mxu1 %v133_v28  ;;  %v6017_v28 = vld [vmem:[#allocation5 + $0x568] sm:$0xff]  }
  0xb1   :  { %5128 = vmatpush3.bf16.msra.mxu0 %v5939_v62  ;;  %v5995_v62 = vld [vmem:[#allocation5 + $0x438] sm:$0xff]  }
  0xb2   :  { %5150 = vmatpush3.bf16.msra.mxu1 %v5940_v63  ;;  %5129 = vmatprep.subr.bf16.mxu0 %v5941_v0  ;;  %v5996_v63 = vld [vmem:[#allocation5 + $0x4b8] sm:$0xff]   ;;  %v87_v0 = vld [vmem:[#allocation2 + $0x88] sm:$0xff] }
  0xb3   :  { %5151 = vmatprep.subr.bf16.mxu1 %v5942_v1  ;;  %v89_v1 = vld [vmem:[#allocation2 + $0x98] sm:$0xff] }
  0xb5   :  { %5130 = vmatpush3.bf16.msra.mxu0 %v5943_v2  ;;  %v135_v2 = vpack.c.bf16 %v87_v0, %v87_v0  ;;  %v6045_v0 = vld [vmem:[#allocation5 + $0x660] sm:$0xff]  }
  0xb6   :  { %5152 = vmatpush3.bf16.msra.mxu1 %v5944_v3  ;;  %5131 = vmatprep.subr.bf16.mxu0 %v5945_v4  ;;  %v137_v3 = vpack.c.bf16 %v89_v1, %v89_v1  ;;  %v86_v4 = vld [vmem:[#allocation2 + $0x80] sm:$0xff] }
  0xb7   :  { %5153 = vmatprep.subr.bf16.mxu1 %v5946_v5  ;;  %v88_v5 = vld [vmem:[#allocation2 + $0x90] sm:$0xff]  ;;  %v6046_v1 = vld [vmem:[#allocation5 + $0x6e0] sm:$0xff]  }
  0xb9   :  { %5132 = vmatpush3.bf16.msra.mxu0 %v5947_v6  ;;  %v134_v6 = vpack.c.bf16 %v86_v4, %v86_v4  ;;  %v6049_v4 = vld [vmem:[#allocation5 + $0x668] sm:$0xff]  }
  0xba   :  { %5154 = vmatpush3.bf16.msra.mxu1 %v5948_v7  ;;  %5133 = vmatprep.subr.bf16.mxu0 %v5949_v8  ;;  %v136_v7 = vpack.c.bf16 %v88_v5, %v88_v5  ;;  %v5997_v8 = vld [vmem:[#allocation5 + $0x540] sm:$0xff]   ;;  %v6050_v5 = vld [vmem:[#allocation5 + $0x6e8] sm:$0xff]  }
  0xbb   :  { %5155 = vmatprep.subr.bf16.mxu1 %v5950_v9  ;;  %v5998_v9 = vld [vmem:[#allocation5 + $0x5c0] sm:$0xff]  }
  0xbd   :  { %5134 = vmatpush3.bf16.msra.mxu0 %v5951_v10  ;;  %v5999_v10 = vld [vmem:[#allocation5 + $0x500] sm:$0xff]  }
  0xbe   :  { %5156 = vmatpush3.bf16.msra.mxu1 %v5952_v11  ;;  %5135 = vmatprep.subr.bf16.mxu0 %v5953_v12  ;;  %v6000_v11 = vld [vmem:[#allocation5 + $0x580] sm:$0xff]   ;;  %v6001_v12 = vld [vmem:[#allocation5 + $0x548] sm:$0xff]  }
  0xbf   :  { %5157 = vmatprep.subr.bf16.mxu1 %v5954_v13  ;;  %v6002_v13 = vld [vmem:[#allocation5 + $0x5c8] sm:$0xff]  }
  0xc1   :  { %5136 = vmatpush3.bf16.msra.mxu0 %v5955_v14  ;;  %v6003_v14 = vld [vmem:[#allocation5 + $0x508] sm:$0xff]  }
  0xc2   :  { %5158 = vmatpush3.bf16.msra.mxu1 %v5956_v15  ;;  %5137 = vmatprep.subr.bf16.mxu0 %v5957_v16  ;;  %v6004_v15 = vld [vmem:[#allocation5 + $0x588] sm:$0xff]   ;;  %v6005_v16 = vld [vmem:[#allocation5 + $0x550] sm:$0xff]  }
  0xc3   :  { %5159 = vmatprep.subr.bf16.mxu1 %v5958_v17  ;;  %v6006_v17 = vld [vmem:[#allocation5 + $0x5d0] sm:$0xff]  }
  0xc5   :  { %5138 = vmatpush3.bf16.msra.mxu0 %v5959_v18  ;;  %v6007_v18 = vld [vmem:[#allocation5 + $0x510] sm:$0xff]  }
  0xc6   :  { %5160 = vmatpush3.bf16.msra.mxu1 %v5960_v19  ;;  %5139 = vmatprep.subr.bf16.mxu0 %v5961_v20  ;;  %v6008_v19 = vld [vmem:[#allocation5 + $0x590] sm:$0xff]   ;;  %v6009_v20 = vld [vmem:[#allocation5 + $0x558] sm:$0xff]  }
  0xc7   :  { %5161 = vmatprep.subr.bf16.mxu1 %v5962_v21  ;;  %v6010_v21 = vld [vmem:[#allocation5 + $0x5d8] sm:$0xff]  }
  0xc9   :  { %5140 = vmatpush3.bf16.msra.mxu0 %v5963_v22  ;;  %v6011_v22 = vld [vmem:[#allocation5 + $0x518] sm:$0xff]  }
  0xca   :  { %5162 = vmatpush3.bf16.msra.mxu1 %v5964_v23  ;;  %5169 = vmatprep.subr.bf16.mxu0 %v5965_v32  ;;  %v6012_v23 = vld [vmem:[#allocation5 + $0x598] sm:$0xff]   ;;  %v6021_v32 = vld [vmem:[#allocation5 + $0x570] sm:$0xff]  }
  0xcb   :  { %5191 = vmatprep.subr.bf16.mxu1 %v5966_v33  ;;  %v6022_v33 = vld [vmem:[#allocation5 + $0x5f0] sm:$0xff]  }
  0xcc   :  { %3516 = vmatmul.mubr.bf16.vlgmr.msra.gmra.mrb[12].mxu0 %v130_v29  ;;  %v6018_v29 = vld [vmem:[#allocation5 + $0x5e8] sm:$0xff]  }
  0xcd   :  { %3556 = vmatmul.mubr.bf16.vlgmr.msra.gmra.mrb[12].mxu1 %v132_v31  ;;  %5170 = vmatpush3.bf16.msra.mxu0 %v5967_v34  ;;  %v6020_v31 = vld [vmem:[#allocation5 + $0x5a8] sm:$0xff]   ;;  %v6023_v34 = vld [vmem:[#allocation5 + $0x530] sm:$0xff]  }
  0xce   :  { %5192 = vmatpush3.bf16.msra.mxu1 %v5968_v35  ;;  %5171 = vmatprep.subr.bf16.mxu0 %v5969_v36  ;;  %v6024_v35 = vld [vmem:[#allocation5 + $0x5b0] sm:$0xff]   ;;  %v6025_v36 = vld [vmem:[#allocation5 + $0x578] sm:$0xff]  }
  0xcf   :  { %5193 = vmatprep.subr.bf16.mxu1 %v5970_v37  ;;  %3595 = vmatprep.mubr.bf16.mxu0 %v135_v2  ;;  %v6026_v37 = vld [vmem:[#allocation5 + $0x5f8] sm:$0xff]   ;;  %v6047_v2 = vld [vmem:[#allocation5 + $0x620] sm:$0xff]  }
  0xd0   :  { %3635 = vmatprep.mubr.bf16.mxu1 %v137_v3  ;;  %v6048_v3 = vld [vmem:[#allocation5 + $0x6a0] sm:$0xff]  }
  0xd1   :  { %5172 = vmatpush3.bf16.msra.mxu0 %v5971_v38  ;;  %v6027_v38 = vld [vmem:[#allocation5 + $0x538] sm:$0xff]  }
  0xd2   :  { %5194 = vmatpush3.bf16.msra.mxu1 %v5972_v39  ;;  %5173 = vmatprep.subr.bf16.mxu0 %v5973_v40  ;;  %v6028_v39 = vld [vmem:[#allocation5 + $0x5b8] sm:$0xff]   ;;  %v91_v40 = vld [vmem:[#allocation2 + $0xa8] sm:$0xff] }
  0xd3   :  { %5195 = vmatprep.subr.bf16.mxu1 %v5974_v41  ;;  %v139_v41 = vpack.c.bf16 %v91_v40, %v91_v40 }
  0xd5   :  { %5174 = vmatpush3.bf16.msra.mxu0 %v5975_v42  ;;  %v93_v42 = vld [vmem:[#allocation2 + $0xb8] sm:$0xff] }
  0xd6   :  { %5196 = vmatpush3.bf16.msra.mxu1 %v5976_v43  ;;  %5175 = vmatprep.subr.bf16.mxu0 %v5977_v44  ;;  %v90_v43 = vld [vmem:[#allocation2 + $0xa0] sm:$0xff]  ;;  %v92_v44 = vld [vmem:[#allocation2 + $0xb0] sm:$0xff] }
  0xd7   :  { %5197 = vmatprep.subr.bf16.mxu1 %v5978_v45  ;;  %v141_v45 = vpack.c.bf16 %v93_v42, %v93_v42 }
  0xd9   :  { %5176 = vmatpush3.bf16.msra.mxu0 %v5979_v46  ;;  %v138_v46 = vpack.c.bf16 %v90_v43, %v90_v43  ;;  %v6077_v43 = vld [vmem:[#allocation5 + $0x760] sm:$0xff]  }
  0xda   :  { %5198 = vmatpush3.bf16.msra.mxu1 %v5980_v47  ;;  %5177 = vmatprep.subr.bf16.mxu0 %v5981_v48  ;;  %v140_v47 = vpack.c.bf16 %v92_v44, %v92_v44  ;;  %v6029_v48 = vld [vmem:[#allocation5 + $0x640] sm:$0xff]  }
  0xdb   :  { %5199 = vmatprep.subr.bf16.mxu1 %v5982_v49  ;;  %v6030_v49 = vld [vmem:[#allocation5 + $0x6c0] sm:$0xff]  }
  0xdd   :  { %5178 = vmatpush3.bf16.msra.mxu0 %v5983_v50  ;;  %v6031_v50 = vld [vmem:[#allocation5 + $0x600] sm:$0xff]  }
  0xde   :  { %5200 = vmatpush3.bf16.msra.mxu1 %v5984_v51  ;;  %5179 = vmatprep.subr.bf16.mxu0 %v5985_v52  ;;  %v6032_v51 = vld [vmem:[#allocation5 + $0x680] sm:$0xff]   ;;  %v6033_v52 = vld [vmem:[#allocation5 + $0x648] sm:$0xff]  }
  0xdf   :  { %5201 = vmatprep.subr.bf16.mxu1 %v5986_v53  ;;  %v6034_v53 = vld [vmem:[#allocation5 + $0x6c8] sm:$0xff]  }
  0xe1   :  { %5180 = vmatpush3.bf16.msra.mxu0 %v5987_v54  ;;  %v6035_v54 = vld [vmem:[#allocation5 + $0x608] sm:$0xff]  }
  0xe2   :  { %5202 = vmatpush3.bf16.msra.mxu1 %v5988_v55  ;;  %5181 = vmatprep.subr.bf16.mxu0 %v5989_v56  ;;  %v6036_v55 = vld [vmem:[#allocation5 + $0x688] sm:$0xff]   ;;  %v6037_v56 = vld [vmem:[#allocation5 + $0x650] sm:$0xff]  }
  0xe3   :  { %5203 = vmatprep.subr.bf16.mxu1 %v5990_v57  ;;  %v6038_v57 = vld [vmem:[#allocation5 + $0x6d0] sm:$0xff]  }
  0xe5   :  { %5182 = vmatpush3.bf16.msra.mxu0 %v5991_v58  ;;  %v6039_v58 = vld [vmem:[#allocation5 + $0x610] sm:$0xff]  }
  0xe6   :  { %5204 = vmatpush3.bf16.msra.mxu1 %v5992_v59  ;;  %5183 = vmatprep.subr.bf16.mxu0 %v5993_v60  ;;  %v6040_v59 = vld [vmem:[#allocation5 + $0x690] sm:$0xff]   ;;  %v6041_v60 = vld [vmem:[#allocation5 + $0x658] sm:$0xff]  }
  0xe7   :  { %5205 = vmatprep.subr.bf16.mxu1 %v5994_v61  ;;  %v6042_v61 = vld [vmem:[#allocation5 + $0x6d8] sm:$0xff]  }
  0xe9   :  { %5184 = vmatpush3.bf16.msra.mxu0 %v5995_v62  ;;  %v6043_v62 = vld [vmem:[#allocation5 + $0x618] sm:$0xff]  }
  0xea   :  { %5206 = vmatpush3.bf16.msra.mxu1 %v5996_v63  ;;  %5213 = vmatprep.subr.bf16.mxu0 %v5997_v8  ;;  %v6044_v63 = vld [vmem:[#allocation5 + $0x698] sm:$0xff]   ;;  %v6053_v8 = vld [vmem:[#allocation5 + $0x670] sm:$0xff]  }
  0xeb   :  { %5235 = vmatprep.subr.bf16.mxu1 %v5998_v9  ;;  %v6054_v9 = vld [vmem:[#allocation5 + $0x6f0] sm:$0xff]  }
  0xec   :  { %3596 = vmatmul.mubr.bf16.vlgmr.msra.gmra.mrb[16].mxu0 %v134_v6  ;;  %v6051_v6 = vld [vmem:[#allocation5 + $0x628] sm:$0xff]  }
  0xed   :  { %3636 = vmatmul.mubr.bf16.vlgmr.msra.gmra.mrb[16].mxu1 %v136_v7  ;;  %5214 = vmatpush3.bf16.msra.mxu0 %v5999_v10  ;;  %v6052_v7 = vld [vmem:[#allocation5 + $0x6a8] sm:$0xff]   ;;  %v6055_v10 = vld [vmem:[#allocation5 + $0x630] sm:$0xff]  }
  0xee   :  { %5236 = vmatpush3.bf16.msra.mxu1 %v6000_v11  ;;  %5215 = vmatprep.subr.bf16.mxu0 %v6001_v12  ;;  %v6056_v11 = vld [vmem:[#allocation5 + $0x6b0] sm:$0xff]   ;;  %v6057_v12 = vld [vmem:[#allocation5 + $0x678] sm:$0xff]  }
  0xef   :  { %5237 = vmatprep.subr.bf16.mxu1 %v6002_v13  ;;  %3675 = vmatprep.mubr.bf16.mxu0 %v139_v41  ;;  %v6058_v13 = vld [vmem:[#allocation5 + $0x6f8] sm:$0xff]  }
  0xf0   :  { %3715 = vmatprep.mubr.bf16.mxu1 %v141_v45  ;;  %v6076_v41 = vld [vmem:[#allocation5 + $0x798] sm:$0xff]  }
  0xf1   :  { %5216 = vmatpush3.bf16.msra.mxu0 %v6003_v14  ;;  %v6059_v14 = vld [vmem:[#allocation5 + $0x638] sm:$0xff]  }
  0xf2   :  { %5238 = vmatpush3.bf16.msra.mxu1 %v6004_v15  ;;  %5217 = vmatprep.subr.bf16.mxu0 %v6005_v16  ;;  %v6060_v15 = vld [vmem:[#allocation5 + $0x6b8] sm:$0xff]   ;;  %v95_v16 = vld [vmem:[#allocation2 + $0xc8] sm:$0xff] }
  0xf3   :  { %5239 = vmatprep.subr.bf16.mxu1 %v6006_v17  ;;  %v97_v17 = vld [vmem:[#allocation2 + $0xd8] sm:$0xff] }
  0xf5   :  { %5218 = vmatpush3.bf16.msra.mxu0 %v6007_v18  ;;  %v94_v18 = vld [vmem:[#allocation2 + $0xc0] sm:$0xff] }
  0xf6   :  { %5240 = vmatpush3.bf16.msra.mxu1 %v6008_v19  ;;  %5219 = vmatprep.subr.bf16.mxu0 %v6009_v20  ;;  %v143_v19 = vpack.c.bf16 %v95_v16, %v95_v16  ;;  %v145_v20 = vpack.c.bf16 %v97_v17, %v97_v17  ;;  %v6096_v16 = vld [vmem:[#allocation5 + $0x880] sm:$0xff]   ;;  %v6097_v17 = vld [vmem:[#allocation5 + $0x848] sm:$0xff]  }
  0xf7   :  { %5241 = vmatprep.subr.bf16.mxu1 %v6010_v21  ;;  %v142_v21 = vpack.c.bf16 %v94_v18, %v94_v18  ;;  %v6098_v18 = vld [vmem:[#allocation5 + $0x8c8] sm:$0xff]  }
  0xf9   :  { %5220 = vmatpush3.bf16.msra.mxu0 %v6011_v22  ;;  %v96_v22 = vld [vmem:[#allocation2 + $0xd0] sm:$0xff] }
  0xfa   :  { %5242 = vmatpush3.bf16.msra.mxu1 %v6012_v23  ;;  %5221 = vmatprep.subr.bf16.mxu0 %v6013_v24  ;;  %v144_v23 = vpack.c.bf16 %v96_v22, %v96_v22  ;;  %v6061_v24 = vld [vmem:[#allocation5 + $0x740] sm:$0xff]   ;;  %v6102_v22 = vld [vmem:[#allocation5 + $0x8d0] sm:$0xff]  }
  0xfb   :  { %5243 = vmatprep.subr.bf16.mxu1 %v6014_v25  ;;  %v6062_v25 = vld [vmem:[#allocation5 + $0x7c0] sm:$0xff]  }
  0xfd   :  { %5222 = vmatpush3.bf16.msra.mxu0 %v6015_v26  ;;  %v6063_v26 = vld [vmem:[#allocation5 + $0x700] sm:$0xff]  }
  0xfe   :  { %5244 = vmatpush3.bf16.msra.mxu1 %v6016_v27  ;;  %5223 = vmatprep.subr.bf16.mxu0 %v6017_v28  ;;  %v6064_v27 = vld [vmem:[#allocation5 + $0x780] sm:$0xff]   ;;  %v6065_v28 = vld [vmem:[#allocation5 + $0x748] sm:$0xff]  }
  0xff   :  { %5245 = vmatprep.subr.bf16.mxu1 %v6018_v29  ;;  %v6066_v29 = vld [vmem:[#allocation5 + $0x7c8] sm:$0xff]  }
 0x101   :  { %5224 = vmatpush3.bf16.msra.mxu0 %v6019_v30  ;;  %v6067_v30 = vld [vmem:[#allocation5 + $0x708] sm:$0xff]  }
 0x102   :  { %5246 = vmatpush3.bf16.msra.mxu1 %v6020_v31  ;;  %5225 = vmatprep.subr.bf16.mxu0 %v6021_v32  ;;  %v6068_v31 = vld [vmem:[#allocation5 + $0x788] sm:$0xff]   ;;  %v6069_v32 = vld [vmem:[#allocation5 + $0x750] sm:$0xff]  }
 0x103   :  { %5247 = vmatprep.subr.bf16.mxu1 %v6022_v33  ;;  %v6070_v33 = vld [vmem:[#allocation5 + $0x7d0] sm:$0xff]  }
 0x105   :  { %5226 = vmatpush3.bf16.msra.mxu0 %v6023_v34  ;;  %v6071_v34 = vld [vmem:[#allocation5 + $0x710] sm:$0xff]  }
 0x106   :  { %5248 = vmatpush3.bf16.msra.mxu1 %v6024_v35  ;;  %5227 = vmatprep.subr.bf16.mxu0 %v6025_v36  ;;  %v6072_v35 = vld [vmem:[#allocation5 + $0x790] sm:$0xff]   ;;  %v6073_v36 = vld [vmem:[#allocation5 + $0x758] sm:$0xff]  }
 0x107   :  { %5249 = vmatprep.subr.bf16.mxu1 %v6026_v37  ;;  %v6074_v37 = vld [vmem:[#allocation5 + $0x7d8] sm:$0xff]  }
 0x109   :  { %5228 = vmatpush3.bf16.msra.mxu0 %v6027_v38 }
 0x10a   :  { %5250 = vmatpush3.bf16.msra.mxu1 %v6028_v39  ;;  %5257 = vmatprep.subr.bf16.mxu0 %v6029_v48  ;;  %v6075_v39 = vld [vmem:[#allocation5 + $0x718] sm:$0xff]  }
 0x10b   :  { %5279 = vmatprep.subr.bf16.mxu1 %v6030_v49  ;;  %v6079_v49 = vld [vmem:[#allocation5 + $0x720] sm:$0xff]  }
 0x10c   :  { %3676 = vmatmul.mubr.bf16.vlgmr.msra.gmra.mrb[20].mxu0 %v138_v46  ;;  %v6078_v46 = vld [vmem:[#allocation5 + $0x7e0] sm:$0xff]  }
 0x10d   :  { %3716 = vmatmul.mubr.bf16.vlgmr.msra.gmra.mrb[20].mxu1 %v140_v47  ;;  %5258 = vmatpush3.bf16.msra.mxu0 %v6031_v50 }
 0x10e   :  { %5280 = vmatpush3.bf16.msra.mxu1 %v6032_v51  ;;  %5259 = vmatprep.subr.bf16.mxu0 %v6033_v52  ;;  %v6080_v51 = vld [vmem:[#allocation5 + $0x7a0] sm:$0xff]  }
 0x10f   :  { %5281 = vmatprep.subr.bf16.mxu1 %v6034_v53  ;;  %3755 = vmatprep.mubr.bf16.mxu0 %v143_v19  ;;  %v4604_v52 = vld [vmem:[#allocation8] ss:$0 sm:$0xff]  ;;  %v6099_v19 = vld [vmem:[#allocation5 + $0x808] sm:$0xff]  }
 0x110   :  { %3795 = vmatprep.mubr.bf16.mxu1 %v145_v20  ;;  %v6100_v20 = vld [vmem:[#allocation5 + $0x888] sm:$0xff]  }
 0x111   :  { %5260 = vmatpush3.bf16.msra.mxu0 %v6035_v54 }
 0x112   :  { %5282 = vmatpush3.bf16.msra.mxu1 %v6036_v55  ;;  %5261 = vmatprep.subr.bf16.mxu0 %v6037_v56  ;;  %v6081_v55 = vld [vmem:[#allocation5 + $0x768] sm:$0xff]  }
 0x113   :  { %5283 = vmatprep.subr.bf16.mxu1 %v6038_v57  ;;  %v6082_v57 = vld [vmem:[#allocation5 + $0x7e8] sm:$0xff]  }
 0x115   :  { %5262 = vmatpush3.bf16.msra.mxu0 %v6039_v58 }
 0x116   :  { %5284 = vmatpush3.bf16.msra.mxu1 %v6040_v59  ;;  %5263 = vmatprep.subr.bf16.mxu0 %v6041_v60  ;;  %v6083_v59 = vld [vmem:[#allocation5 + $0x728] sm:$0xff]  }
 0x117   :  { %5285 = vmatprep.subr.bf16.mxu1 %v6042_v61  ;;  %v6084_v60 = vld [vmem:[#allocation5 + $0x7a8] sm:$0xff]   ;;  %v6085_v61 = vld [vmem:[#allocation5 + $0x770] sm:$0xff]  }
 0x119   :  { %5264 = vmatpush3.bf16.msra.mxu0 %v6043_v62  ;;  %v6086_v62 = vld [vmem:[#allocation5 + $0x7f0] sm:$0xff]  }
 0x11a   :  { %5286 = vmatpush3.bf16.msra.mxu1 %v6044_v63  ;;  %5265 = vmatprep.subr.bf16.mxu0 %v6045_v0  ;;  %v6087_v63 = vld [vmem:[#allocation5 + $0x730] sm:$0xff]  }
 0x11b   :  { %5287 = vmatprep.subr.bf16.mxu1 %v6046_v1  ;;  %v6088_v0 = vld [vmem:[#allocation5 + $0x7b0] sm:$0xff]   ;;  %v6089_v1 = vld [vmem:[#allocation5 + $0x778] sm:$0xff]  }
 0x11d   :  { %5266 = vmatpush3.bf16.msra.mxu0 %v6047_v2  ;;  %v6090_v2 = vld [vmem:[#allocation5 + $0x7f8] sm:$0xff]  }
 0x11e   :  { %5288 = vmatpush3.bf16.msra.mxu1 %v6048_v3  ;;  %5267 = vmatprep.subr.bf16.mxu0 %v6049_v4  ;;  %v6091_v3 = vld [vmem:[#allocation5 + $0x738] sm:$0xff]  }
 0x11f   :  { %5289 = vmatprep.subr.bf16.mxu1 %v6050_v5  ;;  %v6092_v4 = vld [vmem:[#allocation5 + $0x7b8] sm:$0xff]   ;;  %v99_v5 = vld [vmem:[#allocation2 + $0xe8] sm:$0xff] }
 0x121   :  { %5268 = vmatpush3.bf16.msra.mxu0 %v6051_v6  ;;  %v147_v6 = vpack.c.bf16 %v99_v5, %v99_v5  ;;  %v6129_v5 = vld [vmem:[#allocation5 + $0x948] sm:$0xff]  }
 0x122   :  { %5290 = vmatpush3.bf16.msra.mxu1 %v6052_v7  ;;  %5269 = vmatprep.subr.bf16.mxu0 %v6053_v8  ;;  %v101_v7 = vld [vmem:[#allocation2 + $0xf8] sm:$0xff]  ;;  %v98_v8 = vld [vmem:[#allocation2 + $0xe0] sm:$0xff] }
 0x123   :  { %5291 = vmatprep.subr.bf16.mxu1 %v6054_v9  ;;  %v100_v9 = vld [vmem:[#allocation2 + $0xf0] sm:$0xff] }
 0x125   :  { %5270 = vmatpush3.bf16.msra.mxu0 %v6055_v10  ;;  %v149_v10 = vpack.c.bf16 %v101_v7, %v101_v7  ;;  %v6131_v7 = vld [vmem:[#allocation5 + $0x908] sm:$0xff]  }
 0x126   :  { %5292 = vmatpush3.bf16.msra.mxu1 %v6056_v11  ;;  %5271 = vmatprep.subr.bf16.mxu0 %v6057_v12  ;;  %v146_v11 = vpack.c.bf16 %v98_v8, %v98_v8  ;;  %v148_v12 = vpack.c.bf16 %v100_v9, %v100_v9  ;;  %v6132_v8 = vld [vmem:[#allocation5 + $0x988] sm:$0xff]   ;;  %v6133_v9 = vld [vmem:[#allocation5 + $0x950] sm:$0xff]  }
 0x127   :  { %5293 = vmatprep.subr.bf16.mxu1 %v6058_v13  ;;  %v6093_v13 = vld [vmem:[#allocation5 + $0x840] sm:$0xff]  }
 0x129   :  { %5272 = vmatpush3.bf16.msra.mxu0 %v6059_v14  ;;  %v6094_v14 = vld [vmem:[#allocation5 + $0x8c0] sm:$0xff]  }
 0x12a   :  { %5294 = vmatpush3.bf16.msra.mxu1 %v6060_v15  ;;  %5301 = vmatprep.subr.bf16.mxu0 %v6061_v24  ;;  %v6095_v15 = vld [vmem:[#allocation5 + $0x800] sm:$0xff]   ;;  %v6104_v24 = vld [vmem:[#allocation5 + $0x890] sm:$0xff]  }
 0x12b   :  { %5323 = vmatprep.subr.bf16.mxu1 %v6062_v25  ;;  %v6105_v25 = vld [vmem:[#allocation5 + $0x858] sm:$0xff]  }
 0x12c   :  { %3756 = vmatmul.mubr.bf16.vlgmr.msra.gmra.mrb[24].mxu0 %v142_v21  ;;  %v6101_v21 = vld [vmem:[#allocation5 + $0x850] sm:$0xff]  }
 0x12d   :  { %3796 = vmatmul.mubr.bf16.vlgmr.msra.gmra.mrb[24].mxu1 %v144_v23  ;;  %5302 = vmatpush3.bf16.msra.mxu0 %v6063_v26  ;;  %v6103_v23 = vld [vmem:[#allocation5 + $0x810] sm:$0xff]   ;;  %v6106_v26 = vld [vmem:[#allocation5 + $0x8d8] sm:$0xff]  }
 0x12e   :  { %5324 = vmatpush3.bf16.msra.mxu1 %v6064_v27  ;;  %5303 = vmatprep.subr.bf16.mxu0 %v6065_v28  ;;  %v6107_v28 = vld [vmem:[#allocation5 + $0x818] sm:$0xff]  }
 0x12f   :  { %5325 = vmatprep.subr.bf16.mxu1 %v6066_v29  ;;  %3835 = vmatprep.mubr.bf16.mxu0 %v147_v6  ;;  %v6130_v6 = vld [vmem:[#allocation5 + $0x9c8] sm:$0xff]  }
 0x130   :  { %3875 = vmatprep.mubr.bf16.mxu1 %v149_v10  ;;  %v6134_v10 = vld [vmem:[#allocation5 + $0x9d0] sm:$0xff]  }
 0x131   :  { %5304 = vmatpush3.bf16.msra.mxu0 %v6067_v30  ;;  %v6108_v30 = vld [vmem:[#allocation5 + $0x898] sm:$0xff]  }
 0x132   :  { %5326 = vmatpush3.bf16.msra.mxu1 %v6068_v31  ;;  %5305 = vmatprep.subr.bf16.mxu0 %v6069_v32  ;;  %v6109_v32 = vld [vmem:[#allocation5 + $0x860] sm:$0xff]  }
 0x133   :  { %5327 = vmatprep.subr.bf16.mxu1 %v6070_v33 }
 0x135   :  { %5306 = vmatpush3.bf16.msra.mxu0 %v6071_v34 }
 0x136   :  { %5328 = vmatpush3.bf16.msra.mxu1 %v6072_v35  ;;  %5307 = vmatprep.subr.bf16.mxu0 %v6073_v36  ;;  %v6110_v35 = vld [vmem:[#allocation5 + $0x8e0] sm:$0xff]  }
 0x137   :  { %5329 = vmatprep.subr.bf16.mxu1 %v6074_v37 }
 0x139   :  { %5308 = vmatpush3.bf16.msra.mxu0 %v6075_v39 }
 0x13a   :  { %5330 = vmatpush3.bf16.msra.mxu1 %v6076_v41  ;;  %5309 = vmatprep.subr.bf16.mxu0 %v6077_v43  ;;  %v6112_v41 = vld [vmem:[#allocation5 + $0x8a0] sm:$0xff]  }
 0x13b   :  { %5331 = vmatprep.subr.bf16.mxu1 %v6078_v46  ;;  %v6114_v46 = vld [vmem:[#allocation5 + $0x8e8] sm:$0xff]  }
 0x13d   :  { %5310 = vmatpush3.bf16.msra.mxu0 %v6079_v49  ;;  %v6117_v49 = vld [vmem:[#allocation5 + $0x870] sm:$0xff]  }
 0x13e   :  { %5332 = vmatpush3.bf16.msra.mxu1 %v6080_v51  ;;  %5311 = vmatprep.subr.bf16.mxu0 %v6081_v55  ;;  %v6119_v51 = vld [vmem:[#allocation5 + $0x830] sm:$0xff]   ;;  %v6123_v55 = vld [vmem:[#allocation5 + $0x838] sm:$0xff]  }
 0x13f   :  { %v5009_v38 = vpop.f32.mrb[0].mxu0  ;;  %5333 = vmatprep.subr.bf16.mxu1 %v6082_v57  ;;  %v103_v57 = vld [vmem:[#allocation2 + $0x108] sm:$0xff] }
 0x140   :  { %v5031_v40 = vpop.f32.mrb[0].mxu1  ;;  %v5010_v42 = vpop.f32.mrb[1].mxu0 }
 0x141   :  { %v5011_v44 = vadd.f32 %v5010_v42, %v5009_v38  ;;  %v5032_v45 = vpop.f32.mrb[1].mxu1  ;;  %v5012_v48 = vpop.f32.mrb[2].mxu0  ;;  %5312 = vmatpush3.bf16.msra.mxu0 %v6083_v59  ;;  %v6111_v38 = vld [vmem:[#allocation5 + $0x820] sm:$0xff]  }
 0x142   :  { %v5033_v47 = vadd.f32 %v5032_v45, %v5031_v40  ;;  %v5034_v50 = vpop.f32.mrb[2].mxu1  ;;  %v5013_v53 = vpop.f32.mrb[3].mxu0  ;;  %5334 = vmatpush3.bf16.msra.mxu1 %v6084_v60  ;;  %5313 = vmatprep.subr.bf16.mxu0 %v6085_v61  ;;  %v6116_v48 = vld [vmem:[#allocation5 + $0x8a8] sm:$0xff]   ;;  %v102_v59 = vld [vmem:[#allocation2 + $0x100] sm:$0xff]  ;;  %v151_v60 = vpack.c.bf16 %v103_v57, %v103_v57 }
 0x143   :  { %v3278_v54 = vadd.f32 %v5011_v44, %v4604_v52  ;;  %v5035_v56 = vpop.f32.mrb[3].mxu1  ;;  %5335 = vmatprep.subr.bf16.mxu1 %v6086_v62  ;;  %v6113_v44 = vld [vmem:[#allocation5 + $0x868] sm:$0xff]   ;;  %v6118_v50 = vld [vmem:[#allocation5 + $0x8f0] sm:$0xff]   ;;  %v6121_v53 = vld [vmem:[#allocation5 + $0x878] sm:$0xff]   ;;  %v150_v62 = vpack.c.bf16 %v102_v59, %v102_v59 }
 0x144   :  { %v6120_v52 = vld [vmem:[#allocation5 + $0x8b0] sm:$0xff]   ;;  %v6124_v56 = vld [vmem:[#allocation5 + $0x8b8] sm:$0xff]   ;;  %v6161_v57 = vld [vmem:[#allocation5 + $0xa48] sm:$0xff]  }
 0x145   :  { %v6432_v58 = vadd.f32 %v5033_v47, %v3278_v54  ;;  %5314 = vmatpush3.bf16.msra.mxu0 %v6087_v63  ;;  %v6115_v47 = vld [vmem:[#allocation5 + $0x828] sm:$0xff]   ;;  %v6122_v54 = vld [vmem:[#allocation5 + $0x8f8] sm:$0xff]   ;;  %v104_v63 = vld [vmem:[#allocation2 + $0x110] sm:$0xff] }
 0x146   :  { %5336 = vmatpush3.bf16.msra.mxu1 %v6088_v0  ;;  %5315 = vmatprep.subr.bf16.mxu0 %v6089_v1  ;;  %v152_v0 = vpack.c.bf16 %v104_v63, %v104_v63  ;;  %v6125_v1 = vld [vmem:[#allocation5 + $0x940] sm:$0xff]   ;;  %v6163_v59 = vld [vmem:[#allocation5 + $0xa08] sm:$0xff]   ;;  %v6167_v63 = vld [vmem:[#allocation5 + $0xa10] sm:$0xff]  }
 0x147   :  { %5337 = vmatprep.subr.bf16.mxu1 %v6090_v2  ;;  %v6126_v2 = vld [vmem:[#allocation5 + $0x9c0] sm:$0xff]  }
 0x149   :  { %5316 = vmatpush3.bf16.msra.mxu0 %v6091_v3  ;;  %v6127_v3 = vld [vmem:[#allocation5 + $0x900] sm:$0xff]  }
 0x14a   :  { %5338 = vmatpush3.bf16.msra.mxu1 %v6092_v4  ;;  %5345 = vmatprep.subr.bf16.mxu0 %v6093_v13  ;;  %v6128_v4 = vld [vmem:[#allocation5 + $0x980] sm:$0xff]   ;;  %v6137_v13 = vld [vmem:[#allocation5 + $0x958] sm:$0xff]  }
 0x14b   :  { %5367 = vmatprep.subr.bf16.mxu1 %v6094_v14 }
 0x14c   :  { %3836 = vmatmul.mubr.bf16.vlgmr.msra.gmra.mrb[28].mxu0 %v146_v11  ;;  %v6135_v11 = vld [vmem:[#allocation5 + $0x910] sm:$0xff]  }
 0x14d   :  { %3876 = vmatmul.mubr.bf16.vlgmr.msra.gmra.mrb[28].mxu1 %v148_v12  ;;  %5346 = vmatpush3.bf16.msra.mxu0 %v6095_v15  ;;  %v6136_v12 = vld [vmem:[#allocation5 + $0x990] sm:$0xff]   ;;  %v6138_v15 = vld [vmem:[#allocation5 + $0x9d8] sm:$0xff]  }
 0x14e   :  { %5368 = vmatpush3.bf16.msra.mxu1 %v6096_v16  ;;  %5347 = vmatprep.subr.bf16.mxu0 %v6097_v17  ;;  %v6139_v17 = vld [vmem:[#allocation5 + $0x918] sm:$0xff]  }
 0x14f   :  { %5369 = vmatprep.subr.bf16.mxu1 %v6098_v18  ;;  %3915 = vmatprep.mubr.bf16.mxu0 %v151_v60  ;;  %v6164_v60 = vld [vmem:[#allocation5 + $0xa88] sm:$0xff]  }
 0x151   :  { %5348 = vmatpush3.bf16.msra.mxu0 %v6099_v19  ;;  %v6140_v19 = vld [vmem:[#allocation5 + $0x998] sm:$0xff]  }
 0x152   :  { %5370 = vmatpush3.bf16.msra.mxu1 %v6100_v20  ;;  %5349 = vmatprep.subr.bf16.mxu0 %v6101_v21 }
 0x153   :  { %5371 = vmatprep.subr.bf16.mxu1 %v6102_v22  ;;  %v6141_v22 = vld [vmem:[#allocation5 + $0x960] sm:$0xff]  }
 0x155   :  { %5350 = vmatpush3.bf16.msra.mxu0 %v6103_v23 }
 0x156   :  { %5372 = vmatpush3.bf16.msra.mxu1 %v6104_v24  ;;  %5351 = vmatprep.subr.bf16.mxu0 %v6105_v25  ;;  %v6142_v25 = vld [vmem:[#allocation5 + $0x9e0] sm:$0xff]  }
 0x157   :  { %5373 = vmatprep.subr.bf16.mxu1 %v6106_v26 }
 0x159   :  { %5352 = vmatpush3.bf16.msra.mxu0 %v6107_v28  ;;  %v6143_v28 = vld [vmem:[#allocation5 + $0x920] sm:$0xff]  }
 0x15a   :  { %5374 = vmatpush3.bf16.msra.mxu1 %v6108_v30  ;;  %5353 = vmatprep.subr.bf16.mxu0 %v6109_v32  ;;  %v6144_v30 = vld [vmem:[#allocation5 + $0x9a0] sm:$0xff]  }
 0x15b   :  { %5375 = vmatprep.subr.bf16.mxu1 %v6110_v35  ;;  %v6147_v35 = vld [vmem:[#allocation5 + $0x928] sm:$0xff]  }
 0x15d   :  { %5354 = vmatpush3.bf16.msra.mxu0 %v6111_v38  ;;  %v6150_v38 = vld [vmem:[#allocation5 + $0x9f0] sm:$0xff]  }
 0x15e   :  { %5376 = vmatpush3.bf16.msra.mxu1 %v6112_v41  ;;  %5355 = vmatprep.subr.bf16.mxu0 %v6113_v44  ;;  %v6153_v41 = vld [vmem:[#allocation5 + $0x978] sm:$0xff]  }
 0x15f   :  { %v5053_v27 = vpop.f32.mrb[4].mxu0  ;;  %5377 = vmatprep.subr.bf16.mxu1 %v6114_v46  ;;  %v6156_v44 = vld [vmem:[#allocation5 + $0x9b8] sm:$0xff]  }
 0x160   :  { %v5075_v29 = vpop.f32.mrb[4].mxu1  ;;  %v5054_v31 = vpop.f32.mrb[5].mxu0  ;;  %v109_v46 = vld [vmem:[#allocation2 + $0x138] sm:$0xff] }
 0x161   :  { %v5055_v33 = vadd.f32 %v5054_v31, %v5053_v27  ;;  %v5076_v34 = vpop.f32.mrb[5].mxu1  ;;  %v5056_v37 = vpop.f32.mrb[6].mxu0  ;;  %5356 = vmatpush3.bf16.msra.mxu0 %v6115_v47 }
 0x162   :  { %v5077_v36 = vadd.f32 %v5076_v34, %v5075_v29  ;;  %v5078_v40 = vpop.f32.mrb[6].mxu1  ;;  %v5057_v42 = vpop.f32.mrb[7].mxu0  ;;  %5378 = vmatpush3.bf16.msra.mxu1 %v6116_v48  ;;  %5357 = vmatprep.subr.bf16.mxu0 %v6117_v49  ;;  %v6146_v34 = vld [vmem:[#allocation5 + $0x9e8] sm:$0xff]   ;;  %v6149_v37 = vld [vmem:[#allocation5 + $0x970] sm:$0xff]   ;;  %v157_v48 = vpack.c.bf16 %v109_v46, %v109_v46  ;;  %v106_v49 = vld [vmem:[#allocation2 + $0x120] sm:$0xff] }
 0x163   :  { %v3358_v39 = vadd.f32 %v5055_v33, %v6432_v58  ;;  %v5079_v45 = vpop.f32.mrb[7].mxu1  ;;  %5379 = vmatprep.subr.bf16.mxu1 %v6118_v50  ;;  %v105_v58 = vld [vmem:[#allocation2 + $0x118] sm:$0xff]  ;;  %v6145_v33 = vld [vmem:[#allocation5 + $0x968] sm:$0xff]   ;;  %v6152_v40 = vld [vmem:[#allocation5 + $0x9b0] sm:$0xff]  }
 0x164   :  { %v153_v61 = vpack.c.bf16 %v105_v58, %v105_v58  ;;  %v6154_v42 = vld [vmem:[#allocation5 + $0x9f8] sm:$0xff]   ;;  %v107_v45 = vld [vmem:[#allocation2 + $0x128] sm:$0xff]  ;;  %v108_v50 = vld [vmem:[#allocation2 + $0x130] sm:$0xff] }
 0x165   :  { %v6435_v43 = vadd.f32 %v5077_v36, %v3358_v39  ;;  %5358 = vmatpush3.bf16.msra.mxu0 %v6119_v51  ;;  %v6148_v36 = vld [vmem:[#allocation5 + $0x9a8] sm:$0xff]   ;;  %v6151_v39 = vld [vmem:[#allocation5 + $0x930] sm:$0xff]   ;;  %v155_v47 = vpack.c.bf16 %v107_v45, %v107_v45  ;;  %v154_v51 = vpack.c.bf16 %v106_v49, %v106_v49 }
 0x166   :  { %5380 = vmatpush3.bf16.msra.mxu1 %v6120_v52  ;;  %5359 = vmatprep.subr.bf16.mxu0 %v6121_v53  ;;  %v156_v52 = vpack.c.bf16 %v108_v50, %v108_v50  ;;  %v6157_v53 = vld [vmem:[#allocation5 + $0xa40] sm:$0xff]   ;;  %v6162_v58 = vld [vmem:[#allocation5 + $0xac8] sm:$0xff]   ;;  %v6197_v49 = vld [vmem:[#allocation5 + $0xb50] sm:$0xff]  }
 0x167   :  { %5381 = vmatprep.subr.bf16.mxu1 %v6122_v54  ;;  %3955 = vmatprep.mubr.bf16.mxu1 %v153_v61  ;;  %v6158_v54 = vld [vmem:[#allocation5 + $0xac0] sm:$0xff]   ;;  %v6165_v61 = vld [vmem:[#allocation5 + $0xa50] sm:$0xff]   ;;  %v6193_v45 = vld [vmem:[#allocation5 + $0xb48] sm:$0xff]  }
 0x168   :  { %v6194_v46 = vld [vmem:[#allocation5 + $0xbc8] sm:$0xff]   ;;  %v6198_v50 = vld [vmem:[#allocation5 + $0xbd0] sm:$0xff]  }
 0x169   :  { %5360 = vmatpush3.bf16.msra.mxu0 %v6123_v55  ;;  %v6159_v55 = vld [vmem:[#allocation5 + $0xa00] sm:$0xff]  }
 0x16a   :  { %5382 = vmatpush3.bf16.msra.mxu1 %v6124_v56  ;;  %5389 = vmatprep.subr.bf16.mxu0 %v6125_v1  ;;  %v6160_v56 = vld [vmem:[#allocation5 + $0xa80] sm:$0xff]   ;;  %v6169_v1 = vld [vmem:[#allocation5 + $0xa58] sm:$0xff]  }
 0x16b   :  { %5411 = vmatprep.subr.bf16.mxu1 %v6126_v2  ;;  %v6170_v2 = vld [vmem:[#allocation5 + $0xad8] sm:$0xff]  }
 0x16c   :  { %3916 = vmatmul.mubr.bf16.vlgmr.msra.gmra.mrb[32].mxu0 %v150_v62  ;;  %v6166_v62 = vld [vmem:[#allocation5 + $0xad0] sm:$0xff]  }
 0x16d   :  { %3956 = vmatmul.mubr.bf16.vlgmr.msra.gmra.mrb[32].mxu1 %v152_v0  ;;  %5390 = vmatpush3.bf16.msra.mxu0 %v6127_v3  ;;  %v6168_v0 = vld [vmem:[#allocation5 + $0xa90] sm:$0xff]  }
 0x16e   :  { %5412 = vmatpush3.bf16.msra.mxu1 %v6128_v4  ;;  %5391 = vmatprep.subr.bf16.mxu0 %v6129_v5  ;;  %v6171_v4 = vld [vmem:[#allocation5 + $0xa18] sm:$0xff]  }
 0x16f   :  { %5413 = vmatprep.subr.bf16.mxu1 %v6130_v6  ;;  %3995 = vmatprep.mubr.bf16.mxu0 %v155_v47  ;;  %v6172_v6 = vld [vmem:[#allocation5 + $0xa98] sm:$0xff]   ;;  %v6195_v47 = vld [vmem:[#allocation5 + $0xb08] sm:$0xff]  }
 0x170   :  { %4035 = vmatprep.mubr.bf16.mxu1 %v157_v48  ;;  %v6196_v48 = vld [vmem:[#allocation5 + $0xb88] sm:$0xff]  }
 0x171   :  { %5392 = vmatpush3.bf16.msra.mxu0 %v6131_v7 }
 0x172   :  { %5414 = vmatpush3.bf16.msra.mxu1 %v6132_v8  ;;  %5393 = vmatprep.subr.bf16.mxu0 %v6133_v9  ;;  %v6173_v8 = vld [vmem:[#allocation5 + $0xa60] sm:$0xff]  }
 0x173   :  { %5415 = vmatprep.subr.bf16.mxu1 %v6134_v10 }
 0x175   :  { %5394 = vmatpush3.bf16.msra.mxu0 %v6135_v11  ;;  %v6174_v11 = vld [vmem:[#allocation5 + $0xae0] sm:$0xff]  }
 0x176   :  { %5416 = vmatpush3.bf16.msra.mxu1 %v6136_v12  ;;  %5395 = vmatprep.subr.bf16.mxu0 %v6137_v13 }
 0x177   :  { %5417 = vmatprep.subr.bf16.mxu1 %v6138_v15 }
 0x179   :  { %5396 = vmatpush3.bf16.msra.mxu0 %v6139_v17  ;;  %v6176_v17 = vld [vmem:[#allocation5 + $0xaa0] sm:$0xff]  }
 0x17a   :  { %5418 = vmatpush3.bf16.msra.mxu1 %v6140_v19  ;;  %5397 = vmatprep.subr.bf16.mxu0 %v6141_v22  ;;  %v6178_v22 = vld [vmem:[#allocation5 + $0xae8] sm:$0xff]  }
 0x17b   :  { %5419 = vmatprep.subr.bf16.mxu1 %v6142_v25  ;;  %v6181_v25 = vld [vmem:[#allocation5 + $0xa70] sm:$0xff]  }
 0x17d   :  { %5398 = vmatpush3.bf16.msra.mxu0 %v6143_v28  ;;  %v6184_v28 = vld [vmem:[#allocation5 + $0xab0] sm:$0xff]  }
 0x17e   :  { %5420 = vmatpush3.bf16.msra.mxu1 %v6144_v30  ;;  %5399 = vmatprep.subr.bf16.mxu0 %v6145_v33  ;;  %v6186_v30 = vld [vmem:[#allocation5 + $0xaf8] sm:$0xff]   ;;  %v111_v33 = vld [vmem:[#allocation2 + $0x148] sm:$0xff] }
 0x17f   :  { %v5097_v14 = vpop.f32.mrb[8].mxu0  ;;  %5421 = vmatprep.subr.bf16.mxu1 %v6146_v34  ;;  %v159_v34 = vpack.c.bf16 %v111_v33, %v111_v33 }
 0x180   :  { %v5119_v16 = vpop.f32.mrb[8].mxu1  ;;  %v5098_v18 = vpop.f32.mrb[9].mxu0 }
 0x181   :  { %v5099_v20 = vadd.f32 %v5098_v18, %v5097_v14  ;;  %v5120_v21 = vpop.f32.mrb[9].mxu1  ;;  %v5100_v24 = vpop.f32.mrb[10].mxu0  ;;  %5400 = vmatpush3.bf16.msra.mxu0 %v6147_v35  ;;  %v6175_v14 = vld [vmem:[#allocation5 + $0xa20] sm:$0xff]   ;;  %v113_v35 = vld [vmem:[#allocation2 + $0x158] sm:$0xff] }
 0x182   :  { %v5121_v23 = vadd.f32 %v5120_v21, %v5119_v16  ;;  %v5122_v27 = vpop.f32.mrb[10].mxu1  ;;  %v5101_v29 = vpop.f32.mrb[11].mxu0  ;;  %5422 = vmatpush3.bf16.msra.mxu1 %v6148_v36  ;;  %5401 = vmatprep.subr.bf16.mxu0 %v6149_v37  ;;  %v6180_v24 = vld [vmem:[#allocation5 + $0xaa8] sm:$0xff]   ;;  %v110_v36 = vld [vmem:[#allocation2 + $0x140] sm:$0xff]  ;;  %v112_v37 = vld [vmem:[#allocation2 + $0x150] sm:$0xff] }
 0x183   :  { %v3438_v26 = vadd.f32 %v5099_v20, %v6435_v43  ;;  %v5123_v32 = vpop.f32.mrb[11].mxu1  ;;  %5423 = vmatprep.subr.bf16.mxu1 %v6150_v38  ;;  %v6155_v43 = vld [vmem:[#allocation5 + $0x938] sm:$0xff]   ;;  %v6177_v20 = vld [vmem:[#allocation5 + $0xa68] sm:$0xff]   ;;  %v6183_v27 = vld [vmem:[#allocation5 + $0xa30] sm:$0xff]   ;;  %v161_v38 = vpack.c.bf16 %v113_v35, %v113_v35 }
 0x184   :  { %v6185_v29 = vld [vmem:[#allocation5 + $0xa78] sm:$0xff]  }
 0x185   :  { %v6438_v31 = vadd.f32 %v5121_v23, %v3438_v26  ;;  %5402 = vmatpush3.bf16.msra.mxu0 %v6151_v39  ;;  %v6179_v23 = vld [vmem:[#allocation5 + $0xa28] sm:$0xff]   ;;  %v6182_v26 = vld [vmem:[#allocation5 + $0xaf0] sm:$0xff]   ;;  %v6188_v32 = vld [vmem:[#allocation5 + $0xab8] sm:$0xff]   ;;  %v158_v39 = vpack.c.bf16 %v110_v36, %v110_v36 }
 0x186   :  { %5424 = vmatpush3.bf16.msra.mxu1 %v6152_v40  ;;  %5403 = vmatprep.subr.bf16.mxu0 %v6153_v41  ;;  %v160_v40 = vpack.c.bf16 %v112_v37, %v112_v37  ;;  %v6189_v41 = vld [vmem:[#allocation5 + $0xb40] sm:$0xff]  }
 0x187   :  { %5425 = vmatprep.subr.bf16.mxu1 %v6154_v42  ;;  %v6190_v42 = vld [vmem:[#allocation5 + $0xbc0] sm:$0xff]  }
 0x189   :  { %5404 = vmatpush3.bf16.msra.mxu0 %v6155_v43  ;;  %v6191_v43 = vld [vmem:[#allocation5 + $0xb00] sm:$0xff]  }
 0x18a   :  { %5426 = vmatpush3.bf16.msra.mxu1 %v6156_v44  ;;  %5433 = vmatprep.subr.bf16.mxu0 %v6157_v53  ;;  %v6192_v44 = vld [vmem:[#allocation5 + $0xb80] sm:$0xff]   ;;  %v6201_v53 = vld [vmem:[#allocation5 + $0xb58] sm:$0xff]  }
 0x18b   :  { %5455 = vmatprep.subr.bf16.mxu1 %v6158_v54  ;;  %v6202_v54 = vld [vmem:[#allocation5 + $0xbd8] sm:$0xff]  }
 0x18c   :  { %3996 = vmatmul.mubr.bf16.vlgmr.msra.gmra.mrb[36].mxu0 %v154_v51  ;;  %v6199_v51 = vld [vmem:[#allocation5 + $0xb10] sm:$0xff]  }
 0x18d   :  { %4036 = vmatmul.mubr.bf16.vlgmr.msra.gmra.mrb[36].mxu1 %v156_v52  ;;  %5434 = vmatpush3.bf16.msra.mxu0 %v6159_v55  ;;  %v6200_v52 = vld [vmem:[#allocation5 + $0xb90] sm:$0xff]  }
 0x18e   :  { %5456 = vmatpush3.bf16.msra.mxu1 %v6160_v56  ;;  %5435 = vmatprep.subr.bf16.mxu0 %v6161_v57  ;;  %v6203_v56 = vld [vmem:[#allocation5 + $0xb18] sm:$0xff]  }
 0x18f   :  { %5457 = vmatprep.subr.bf16.mxu1 %v6162_v58  ;;  %4075 = vmatprep.mubr.bf16.mxu0 %v159_v34  ;;  %v6204_v58 = vld [vmem:[#allocation5 + $0xb98] sm:$0xff]  }
 0x190   :  { %4115 = vmatprep.mubr.bf16.mxu1 %v161_v38 }
 0x191   :  { %5436 = vmatpush3.bf16.msra.mxu0 %v6163_v59 }
 0x192   :  { %5458 = vmatpush3.bf16.msra.mxu1 %v6164_v60  ;;  %5437 = vmatprep.subr.bf16.mxu0 %v6165_v61  ;;  %v6205_v60 = vld [vmem:[#allocation5 + $0xb60] sm:$0xff]  }
 0x193   :  { %5459 = vmatprep.subr.bf16.mxu1 %v6166_v62 }
 0x195   :  { %5438 = vmatpush3.bf16.msra.mxu0 %v6167_v63  ;;  %v6206_v63 = vld [vmem:[#allocation5 + $0xbe0] sm:$0xff]  }
 0x196   :  { %5460 = vmatpush3.bf16.msra.mxu1 %v6168_v0  ;;  %5439 = vmatprep.subr.bf16.mxu0 %v6169_v1 }
 0x197   :  { %5461 = vmatprep.subr.bf16.mxu1 %v6170_v2  ;;  %v6207_v2 = vld [vmem:[#allocation5 + $0xb20] sm:$0xff]  }
 0x199   :  { %5440 = vmatpush3.bf16.msra.mxu0 %v6171_v4 }
 0x19a   :  { %5462 = vmatpush3.bf16.msra.mxu1 %v6172_v6  ;;  %5441 = vmatprep.subr.bf16.mxu0 %v6173_v8  ;;  %v6209_v8 = vld [vmem:[#allocation5 + $0xb68] sm:$0xff]  }
 0x19b   :  { %5463 = vmatprep.subr.bf16.mxu1 %v6174_v11  ;;  %v6211_v11 = vld [vmem:[#allocation5 + $0xb28] sm:$0xff]  }
 0x19d   :  { %5442 = vmatpush3.bf16.msra.mxu0 %v6175_v14  ;;  %v6214_v14 = vld [vmem:[#allocation5 + $0xbf0] sm:$0xff]  }
 0x19e   :  { %5464 = vmatpush3.bf16.msra.mxu1 %v6176_v17  ;;  %5443 = vmatprep.subr.bf16.mxu0 %v6177_v20  ;;  %v6217_v17 = vld [vmem:[#allocation5 + $0xb78] sm:$0xff]  }
 0x19f   :  { %v5141_v3 = vpop.f32.mrb[12].mxu0  ;;  %5465 = vmatprep.subr.bf16.mxu1 %v6178_v22  ;;  %v6220_v20 = vld [vmem:[#allocation5 + $0xbb8] sm:$0xff]  }
 0x1a0   :  { %v5163_v5 = vpop.f32.mrb[12].mxu1  ;;  %v5142_v7 = vpop.f32.mrb[13].mxu0  ;;  %v117_v22 = vld [vmem:[#allocation2 + $0x178] sm:$0xff] }
 0x1a1   :  { %v5143_v9 = vadd.f32 %v5142_v7, %v5141_v3  ;;  %v5164_v10 = vpop.f32.mrb[13].mxu1  ;;  %v5144_v13 = vpop.f32.mrb[14].mxu0  ;;  %5444 = vmatpush3.bf16.msra.mxu0 %v6179_v23  ;;  %v114_v23 = vld [vmem:[#allocation2 + $0x160] sm:$0xff] }
 0x1a2   :  { %v5165_v12 = vadd.f32 %v5164_v10, %v5163_v5  ;;  %v5166_v16 = vpop.f32.mrb[14].mxu1  ;;  %v5145_v18 = vpop.f32.mrb[15].mxu0  ;;  %5466 = vmatpush3.bf16.msra.mxu1 %v6180_v24  ;;  %5445 = vmatprep.subr.bf16.mxu0 %v6181_v25  ;;  %v6208_v5 = vld [vmem:[#allocation5 + $0xba0] sm:$0xff]   ;;  %v6210_v10 = vld [vmem:[#allocation5 + $0xbe8] sm:$0xff]   ;;  %v6213_v13 = vld [vmem:[#allocation5 + $0xb70] sm:$0xff]   ;;  %v165_v25 = vpack.c.bf16 %v117_v22, %v117_v22 }
 0x1a3   :  { %v3518_v15 = vadd.f32 %v5143_v9, %v6438_v31  ;;  %v5167_v21 = vpop.f32.mrb[15].mxu1  ;;  %5467 = vmatprep.subr.bf16.mxu1 %v6182_v26  ;;  %v6187_v31 = vld [vmem:[#allocation5 + $0xa38] sm:$0xff]   ;;  %v6216_v16 = vld [vmem:[#allocation5 + $0xbb0] sm:$0xff]   ;;  %v162_v26 = vpack.c.bf16 %v114_v23, %v114_v23 }
 0x1a4   :  { %v6218_v18 = vld [vmem:[#allocation5 + $0xbf8] sm:$0xff]   ;;  %v115_v21 = vld [vmem:[#allocation2 + $0x168] sm:$0xff]  ;;  %v4221_v23 = vld [vmem:[#allocation7 + $0x70] sm:$0xff] }
 0x1a5   :  { %v6441_v19 = vadd.f32 %v5165_v12, %v3518_v15  ;;  %5446 = vmatpush3.bf16.msra.mxu0 %v6183_v27  ;;  %v6212_v12 = vld [vmem:[#allocation5 + $0xba8] sm:$0xff]   ;;  %v6215_v15 = vld [vmem:[#allocation5 + $0xb30] sm:$0xff]   ;;  %v163_v24 = vpack.c.bf16 %v115_v21, %v115_v21 }
 0x1a6   :  { %5468 = vmatpush3.bf16.msra.mxu1 %v6184_v28  ;;  %5447 = vmatprep.subr.bf16.mxu0 %v6185_v29  ;;  %v116_v27 = vld [vmem:[#allocation2 + $0x170] sm:$0xff]  ;;  %v4220_v21 = vld [vmem:[#allocation7 + $0x68] sm:$0xff] }
 0x1a7   :  { %5469 = vmatprep.subr.bf16.mxu1 %v6186_v30  ;;  %v164_v28 = vpack.c.bf16 %v116_v27, %v116_v27  ;;  %v4303_v27 = vld [vmem:[#allocation7 + $0x80] sm:$0xff] }
 0x1a9   :  { %5448 = vmatpush3.bf16.msra.mxu0 %v6187_v31 }
 0x1aa   :  { %5470 = vmatpush3.bf16.msra.mxu1 %v6188_v32  ;;  %5477 = vmatprep.subr.bf16.mxu0 %v6189_v41 }
 0x1ab   :  { %5499 = vmatprep.subr.bf16.mxu1 %v6190_v42 }
 0x1ac   :  { %4076 = vmatmul.mubr.bf16.vlgmr.msra.gmra.mrb[40].mxu0 %v158_v39 }
 0x1ad   :  { %4116 = vmatmul.mubr.bf16.vlgmr.msra.gmra.mrb[40].mxu1 %v160_v40  ;;  %5478 = vmatpush3.bf16.msra.mxu0 %v6191_v43 }
 0x1ae   :  { %5500 = vmatpush3.bf16.msra.mxu1 %v6192_v44  ;;  %5479 = vmatprep.subr.bf16.mxu0 %v6193_v45 }
 0x1af   :  { %5501 = vmatprep.subr.bf16.mxu1 %v6194_v46  ;;  %4155 = vmatprep.mubr.bf16.mxu0 %v163_v24  ;;  %v4222_v24 = vld [vmem:[#allocation7 + $0x78] sm:$0xff] }
 0x1b0   :  { %4195 = vmatprep.mubr.bf16.mxu1 %v165_v25  ;;  %v5751_v25 = vpack.c.bf16 %v4222_v24, %v4221_v23 }
 0x1b1   :  { %5480 = vmatpush3.bf16.msra.mxu0 %v6195_v47 }
 0x1b2   :  { %5502 = vmatpush3.bf16.msra.mxu1 %v6196_v48  ;;  %5481 = vmatprep.subr.bf16.mxu0 %v6197_v49 }
 0x1b3   :  { %5503 = vmatprep.subr.bf16.mxu1 %v6198_v50 }
 0x1b5   :  { %5482 = vmatpush3.bf16.msra.mxu0 %v6199_v51 }
 0x1b6   :  { %5504 = vmatpush3.bf16.msra.mxu1 %v6200_v52  ;;  %5483 = vmatprep.subr.bf16.mxu0 %v6201_v53  ;;  %v4207_v53 = vld [vmem:[#allocation7] sm:$0xff] }
 0x1b7   :  { %5505 = vmatprep.subr.bf16.mxu1 %v6202_v54  ;;  %v4208_v54 = vld [vmem:[#allocation7 + $0x8] sm:$0xff] }
 0x1b9   :  { %5484 = vmatpush3.bf16.msra.mxu0 %v6203_v56  ;;  %v6355_v56 = vmov 0.0|0.0  }
 0x1ba   :  { %5506 = vmatpush3.bf16.msra.mxu1 %v6204_v58  ;;  %5485 = vmatprep.subr.bf16.mxu0 %v6205_v60  ;;  %v4210_v58 = vld [vmem:[#allocation7 + $0x18] sm:$0xff] }
 0x1bb   :  { %5507 = vmatprep.subr.bf16.mxu1 %v6206_v63 }
 0x1bd   :  { %5486 = vmatpush3.bf16.msra.mxu0 %v6207_v2 }
 0x1be   :  { %5508 = vmatpush3.bf16.msra.mxu1 %v6208_v5  ;;  %5487 = vmatprep.subr.bf16.mxu0 %v6209_v8  ;;  %v4212_v8 = vld [vmem:[#allocation7 + $0x28] sm:$0xff] }
 0x1bf   :  { %v5185_v55 = vpop.f32.mrb[16].mxu0  ;;  %5509 = vmatprep.subr.bf16.mxu1 %v6210_v10 }
 0x1c0   :  { %v5207_v57 = vpop.f32.mrb[16].mxu1  ;;  %v5186_v59 = vpop.f32.mrb[17].mxu0 }
 0x1c1   :  { %v5187_v61 = vadd.f32 %v5186_v59, %v5185_v55  ;;  %v5208_v62 = vpop.f32.mrb[17].mxu1  ;;  %v5188_v1 = vpop.f32.mrb[18].mxu0  ;;  %5488 = vmatpush3.bf16.msra.mxu0 %v6211_v11  ;;  %v4209_v55 = vld [vmem:[#allocation7 + $0x10] sm:$0xff] }
 0x1c2   :  { %v5209_v0 = vadd.f32 %v5208_v62, %v5207_v57  ;;  %v5210_v4 = vpop.f32.mrb[18].mxu1  ;;  %v5189_v6 = vpop.f32.mrb[19].mxu0  ;;  %5510 = vmatpush3.bf16.msra.mxu1 %v6212_v12  ;;  %5489 = vmatprep.subr.bf16.mxu0 %v6213_v13  ;;  %v5730_v57 = vpack.c.bf16 %v4208_v54, %v4207_v53  ;;  %v5733_v59 = vpack.c.bf16 %v4210_v58, %v4209_v55  ;;  %v4213_v11 = vld [vmem:[#allocation7 + $0x30] sm:$0xff]  ;;  %v4214_v12 = vld [vmem:[#allocation7 + $0x38] sm:$0xff] }
 0x1c3   :  { %v3598_v3 = vadd.f32 %v5187_v61, %v6441_v19  ;;  %v5211_v9 = vpop.f32.mrb[19].mxu1  ;;  %5511 = vmatprep.subr.bf16.mxu1 %v6214_v14  ;;  %v6219_v19 = vld [vmem:[#allocation5 + $0xb38] sm:$0xff]   ;;  %v5739_v13 = vpack.c.bf16 %v4214_v12, %v4213_v11  ;;  %v4215_v14 = vld [vmem:[#allocation7 + $0x40] sm:$0xff] }
 0x1c5   :  { %v3638_v7 = vadd.f32 %v5209_v0, %v3598_v3  ;;  %5490 = vmatpush3.bf16.msra.mxu0 %v6215_v15  ;;  %v4216_v15 = vld [vmem:[#allocation7 + $0x48] sm:$0xff] }
 0x1c6   :  { %5512 = vmatpush3.bf16.msra.mxu1 %v6216_v16  ;;  %5491 = vmatprep.subr.bf16.mxu0 %v6217_v17  ;;  %v5742_v16 = vpack.c.bf16 %v4216_v15, %v4215_v14  ;;  %v4217_v17 = vld [vmem:[#allocation7 + $0x50] sm:$0xff] }
 0x1c7   :  { %5513 = vmatprep.subr.bf16.mxu1 %v6218_v18  ;;  %v4218_v18 = vld [vmem:[#allocation7 + $0x58] sm:$0xff] }
 0x1c9   :  { %5492 = vmatpush3.bf16.msra.mxu0 %v6219_v19  ;;  %v5745_v19 = vpack.c.bf16 %v4218_v18, %v4217_v17 }
 0x1ca   :  { %5514 = vmatpush3.bf16.msra.mxu1 %v6220_v20  ;;  %5729 = vmatprep.subr.bf16.mxu0 %v6355_v56  ;;  %v4219_v20 = vld [vmem:[#allocation7 + $0x60] sm:$0xff] }
 0x1cb   :  { %5753 = vmatprep.subr.bf16.mxu1 %v6355_v56  ;;  %v5748_v22 = vpack.c.bf16 %v4220_v21, %v4219_v20 }
 0x1cc   :  { %4156 = vmatmul.mubr.bf16.vlgmr.msra.gmra.mrb[44].mxu0 %v162_v26  ;;  %v6357_v26 = vmov 0.0  }
 0x1cd   :  { %4196 = vmatmul.mubr.bf16.vlgmr.msra.gmra.mrb[44].mxu1 %v164_v28  ;;  %5731 = vmatpush3.bf16.msra.mxu0 %v5730_v57  ;;  %v4304_v28 = vld [vmem:[#allocation7 + $0x88] sm:$0xff] }
 0x1ce   :  { %5732 = vmatprep.subr.bf16.mxu0 %v6355_v56  ;;  %5621 = vmatprep.mubr.msk.f32.mxu0 %vm6356_vm0, %v6357_v26 }
 0x1cf   :  { %5656 = vmatprep.mubr.msk.f32.mxu1 %vm6356_vm0, %v6357_v26 }
 0x1d1   :  { %5734 = vmatpush3.bf16.msra.mxu0 %v5733_v59 }
 0x1d2   :  { %5735 = vmatprep.subr.bf16.mxu0 %v6355_v56 }
 0x1df   :  { %v5229_v29 = vpop.f32.mrb[20].mxu0 }
 0x1e0   :  { %v5251_v30 = vpop.f32.mrb[20].mxu1  ;;  %v5230_v31 = vpop.f32.mrb[21].mxu0 }
 0x1e1   :  { %v5231_v32 = vadd.f32 %v5230_v31, %v5229_v29  ;;  %v5252_v33 = vpop.f32.mrb[21].mxu1  ;;  %v5232_v34 = vpop.f32.mrb[22].mxu0  ;;  %v4305_v29 = vld [vmem:[#allocation7 + $0x90] sm:$0xff]  ;;  %v4306_v31 = vld [vmem:[#allocation7 + $0x98] sm:$0xff] }
 0x1e2   :  { %v5253_v35 = vadd.f32 %v5252_v33, %v5251_v30  ;;  %v5254_v36 = vpop.f32.mrb[22].mxu1  ;;  %v5233_v37 = vpop.f32.mrb[23].mxu0  ;;  %v5754_v30 = vpack.c.bf16 %v4304_v28, %v4303_v27  ;;  %v5757_v34 = vpack.c.bf16 %v4306_v31, %v4305_v29  ;;  %v4310_v27 = vld [vmem:[#allocation7 + $0xb8] sm:$0xff]  ;;  %v4311_v29 = vld [vmem:[#allocation7 + $0xc0] sm:$0xff] }
 0x1e3   :  { %v3678_v38 = vadd.f32 %v5231_v32, %v3638_v7  ;;  %v5255_v39 = vpop.f32.mrb[23].mxu1  ;;  %v4211_v7 = vld [vmem:[#allocation7 + $0x20] sm:$0xff] }
 0x1e4   :  { %v5736_v10 = vpack.c.bf16 %v4212_v8, %v4211_v7  ;;  %5755 = vmatpush3.bf16.msra.mxu1 %v5754_v30  ;;  %v4307_v37 = vld [vmem:[#allocation7 + $0xa0] sm:$0xff]  ;;  %v4312_v30 = vld [vmem:[#allocation7 + $0xc8] sm:$0xff] }
 0x1e5   :  { %v3718_v40 = vadd.f32 %v5253_v35, %v3678_v38  ;;  %5756 = vmatprep.subr.bf16.mxu1 %v6355_v56  ;;  %v4308_v38 = vld [vmem:[#allocation7 + $0xa8] sm:$0xff]  ;;  %v5766_v31 = vpack.c.bf16 %v4312_v30, %v4311_v29  ;;  %v4503_v30 = vld [vmem:[#allocation7 + $0x1c0] sm:$0xff] }
 0x1e6   :  { %5737 = vmatpush3.bf16.msra.mxu0 %v5736_v10 }
 0x1e7   :  { %5738 = vmatprep.subr.bf16.mxu0 %v6355_v56 }
 0x1e8   :  { %5758 = vmatpush3.bf16.msra.mxu1 %v5757_v34 }
 0x1e9   :  { %5759 = vmatprep.subr.bf16.mxu1 %v6355_v56 }
 0x1ea   :  { %5740 = vmatpush3.bf16.msra.mxu0 %v5739_v13 }
 0x1eb   :  { %5741 = vmatprep.subr.bf16.mxu0 %v6355_v56 }
 0x1ee   :  { %5743 = vmatpush3.bf16.msra.mxu0 %v5742_v16 }
 0x1ef   :  { %5744 = vmatprep.subr.bf16.mxu0 %v6355_v56 }
 0x1f2   :  { %5746 = vmatpush3.bf16.msra.mxu0 %v5745_v19 }
 0x1f3   :  { %5747 = vmatprep.subr.bf16.mxu0 %v6355_v56 }
 0x1f6   :  { %5749 = vmatpush3.bf16.msra.mxu0 %v5748_v22 }
 0x1f7   :  { %5750 = vmatprep.subr.bf16.mxu0 %v6355_v56 }
 0x1fa   :  { %5752 = vmatpush3.bf16.msra.mxu0 %v5751_v25  ;;  %v4309_v25 = vld [vmem:[#allocation7 + $0xb0] sm:$0xff] }
 0x1fb   :  { %5777 = vmatprep.subr.bf16.mxu0 %v6355_v56  ;;  %v5763_v28 = vpack.c.bf16 %v4310_v27, %v4309_v25  ;;  %v4501_v27 = vld [vmem:[#allocation7 + $0x1b0] sm:$0xff] }
 0x1ff   :  { %v5273_v41 = vpop.f32.mrb[24].mxu0 }
 0x200   :  { %v5295_v42 = vpop.f32.mrb[24].mxu1  ;;  %v5274_v43 = vpop.f32.mrb[25].mxu0 }
 0x201   :  { %v5296_v44 = vpop.f32.mrb[25].mxu1  ;;  %v5275_v45 = vadd.f32 %v5274_v43, %v5273_v41  ;;  %v5276_v47 = vpop.f32.mrb[26].mxu0 }
 0x202   :  { %v5297_v46 = vadd.f32 %v5296_v44, %v5295_v42  ;;  %v5298_v48 = vpop.f32.mrb[26].mxu1  ;;  %v5277_v49 = vpop.f32.mrb[27].mxu0 }
 0x203   :  { %v5299_v50 = vpop.f32.mrb[27].mxu1  ;;  %v3758_v51 = vadd.f32 %v5275_v45, %v3718_v40 }
 0x205   :  { %v3798_v52 = vadd.f32 %v5297_v46, %v3758_v51  ;;  %v5760_v46 = vpack.c.bf16 %v4308_v38, %v4307_v37  ;;  %v4317_v38 = vld [vmem:[#allocation7 + $0xf0] sm:$0xff] }
 0x207   :  { %5761 = vmatpush3.bf16.msra.mxu1 %v5760_v46 }
 0x208   :  { %5762 = vmatprep.subr.bf16.mxu1 %v6355_v56 }
 0x20b   :  { %5764 = vmatpush3.bf16.msra.mxu1 %v5763_v28  ;;  %v4502_v28 = vld [vmem:[#allocation7 + $0x1b8] sm:$0xff] }
 0x20c   :  { %5765 = vmatprep.subr.bf16.mxu1 %v6355_v56  ;;  %v5811_v29 = vpack.c.bf16 %v4502_v28, %v4501_v27 }
 0x20f   :  { %5767 = vmatpush3.bf16.msra.mxu1 %v5766_v31  ;;  %v4504_v31 = vld [vmem:[#allocation7 + $0x1c8] sm:$0xff] }
 0x210   :  { %5768 = vmatprep.subr.bf16.mxu1 %v6355_v56 }
 0x21f   :  { %v5317_v60 = vpop.f32.mrb[28].mxu0 }
 0x220   :  { %v5339_v61 = vpop.f32.mrb[28].mxu1  ;;  %v5318_v62 = vpop.f32.mrb[29].mxu0 }
 0x221   :  { %v5319_v63 = vadd.f32 %v5318_v62, %v5317_v60  ;;  %v5340_v0 = vpop.f32.mrb[29].mxu1  ;;  %v5320_v1 = vpop.f32.mrb[30].mxu0 }
 0x222   :  { %v5341_v2 = vadd.f32 %v5340_v0, %v5339_v61  ;;  %v5342_v3 = vpop.f32.mrb[30].mxu1  ;;  %v5321_v4 = vpop.f32.mrb[31].mxu0 }
 0x223   :  { %v3838_v5 = vadd.f32 %v5319_v63, %v3798_v52  ;;  %v5343_v6 = vpop.f32.mrb[31].mxu1 }
 0x225   :  { %v3878_v9 = vadd.f32 %v5341_v2, %v3838_v5 }
 0x23f   :  { %v5361_v32 = vpop.f32.mrb[32].mxu0 }
 0x240   :  { %v5383_v33 = vpop.f32.mrb[32].mxu1  ;;  %v5362_v35 = vpop.f32.mrb[33].mxu0 }
 0x241   :  { %v5384_v36 = vpop.f32.mrb[33].mxu1  ;;  %v5363_v39 = vadd.f32 %v5362_v35, %v5361_v32  ;;  %v5364_v41 = vpop.f32.mrb[34].mxu0  ;;  %v4313_v32 = vld [vmem:[#allocation7 + $0xd0] sm:$0xff]  ;;  %v4315_v35 = vld [vmem:[#allocation7 + $0xe0] sm:$0xff] }
 0x242   :  { %v5385_v40 = vadd.f32 %v5384_v36, %v5383_v33  ;;  %v5386_v42 = vpop.f32.mrb[34].mxu1  ;;  %v5365_v43 = vpop.f32.mrb[35].mxu0  ;;  %v4314_v33 = vld [vmem:[#allocation7 + $0xd8] sm:$0xff]  ;;  %v4316_v36 = vld [vmem:[#allocation7 + $0xe8] sm:$0xff]  ;;  %v4399_v41 = vld [vmem:[#allocation7 + $0x100] sm:$0xff] }
 0x243   :  { %v5387_v44 = vpop.f32.mrb[35].mxu1  ;;  %v3918_v45 = vadd.f32 %v5363_v39, %v3878_v9  ;;  %v5769_v34 = vpack.c.bf16 %v4314_v33, %v4313_v32  ;;  %v5772_v37 = vpack.c.bf16 %v4316_v36, %v4315_v35  ;;  %v4318_v39 = vld [vmem:[#allocation7 + $0xf8] sm:$0xff]  ;;  %v4400_v42 = vld [vmem:[#allocation7 + $0x108] sm:$0xff]  ;;  %v4401_v43 = vld [vmem:[#allocation7 + $0x110] sm:$0xff]  ;;  %v5814_v32 = vpack.c.bf16 %v4504_v31, %v4503_v30 }
 0x244   :  { %v5778_v44 = vpack.c.bf16 %v4400_v42, %v4399_v41  ;;  %v4505_v33 = vld [vmem:[#allocation7 + $0x1d0] sm:$0xff]  ;;  %v4507_v36 = vld [vmem:[#allocation7 + $0x1e0] sm:$0xff] }
 0x245   :  { %v3958_v47 = vadd.f32 %v5385_v40, %v3918_v45  ;;  %5770 = vmatpush3.bf16.msra.mxu1 %v5769_v34  ;;  %v5775_v40 = vpack.c.bf16 %v4318_v39, %v4317_v38  ;;  %v4402_v45 = vld [vmem:[#allocation7 + $0x118] sm:$0xff]  ;;  %v4509_v39 = vld [vmem:[#allocation7 + $0x1f0] sm:$0xff]  ;;  %v4991_v42 = vld [vmem:[#allocation8 + $0x3] ss:$0 sm:$0xff] }
 0x246   :  { %5771 = vmatprep.subr.bf16.mxu1 %v6355_v56  ;;  %v5781_v46 = vpack.c.bf16 %v4402_v45, %v4401_v43  ;;  %v4506_v34 = vld [vmem:[#allocation7 + $0x1d8] sm:$0xff] }
 0x247   :  { %v5817_v35 = vpack.c.bf16 %v4506_v34, %v4505_v33 }
 0x249   :  { %5773 = vmatpush3.bf16.msra.mxu1 %v5772_v37  ;;  %v4508_v37 = vld [vmem:[#allocation7 + $0x1e8] sm:$0xff] }
 0x24a   :  { %5774 = vmatprep.subr.bf16.mxu1 %v6355_v56  ;;  %v5820_v38 = vpack.c.bf16 %v4508_v37, %v4507_v36 }
 0x24d   :  { %5776 = vmatpush3.bf16.msra.mxu1 %v5775_v40  ;;  %v4510_v40 = vld [vmem:[#allocation7 + $0x1f8] sm:$0xff] }
 0x24e   :  { %5801 = vmatprep.subr.bf16.mxu1 %v6355_v56  ;;  %v5823_v41 = vpack.c.bf16 %v4510_v40, %v4509_v39 }
 0x25f   :  { %v5405_v48 = vpop.f32.mrb[36].mxu0 }
 0x260   :  { %v5427_v49 = vpop.f32.mrb[36].mxu1  ;;  %v5406_v50 = vpop.f32.mrb[37].mxu0 }
 0x261   :  { %v5407_v51 = vadd.f32 %v5406_v50, %v5405_v48  ;;  %v5428_v52 = vpop.f32.mrb[37].mxu1  ;;  %v5408_v53 = vpop.f32.mrb[38].mxu0  ;;  %v4404_v48 = vld [vmem:[#allocation7 + $0x128] sm:$0xff]  ;;  %v4989_v50 = vld [vmem:[#allocation8 + $0x1] ss:$0 sm:$0xff] }
 0x262   :  { %v5429_v54 = vadd.f32 %v5428_v52, %v5427_v49  ;;  %v5430_v55 = vpop.f32.mrb[38].mxu1  ;;  %v5409_v57 = vpop.f32.mrb[39].mxu0 }
 0x263   :  { %v3998_v58 = vadd.f32 %v5407_v51, %v3958_v47  ;;  %v5431_v59 = vpop.f32.mrb[39].mxu1  ;;  %v4403_v47 = vld [vmem:[#allocation7 + $0x120] sm:$0xff] }
 0x264   :  { %v5784_v49 = vpack.c.bf16 %v4404_v48, %v4403_v47  ;;  %v4405_v59 = vld [vmem:[#allocation7 + $0x130] sm:$0xff] }
 0x265   :  { %v4038_v60 = vadd.f32 %v5429_v54, %v3998_v58 }
 0x27f   :  { %v5449_v61 = vpop.f32.mrb[40].mxu0 }
 0x280   :  { %v5471_v62 = vpop.f32.mrb[40].mxu1  ;;  %v5450_v63 = vpop.f32.mrb[41].mxu0 }
 0x281   :  { %v5451_v0 = vadd.f32 %v5450_v63, %v5449_v61  ;;  %v5472_v1 = vpop.f32.mrb[41].mxu1  ;;  %v5452_v2 = vpop.f32.mrb[42].mxu0  ;;  %v4408_v63 = vld [vmem:[#allocation7 + $0x148] sm:$0xff] }
 0x282   :  { %v5473_v3 = vadd.f32 %v5472_v1, %v5471_v62  ;;  %v5474_v4 = vpop.f32.mrb[42].mxu1  ;;  %v5453_v5 = vpop.f32.mrb[43].mxu0  ;;  %v4407_v62 = vld [vmem:[#allocation7 + $0x140] sm:$0xff]  ;;  %v4409_v1 = vld [vmem:[#allocation7 + $0x150] sm:$0xff]  ;;  %v4410_v2 = vld [vmem:[#allocation7 + $0x158] sm:$0xff] }
 0x283   :  { %v4078_v6 = vadd.f32 %v5451_v0, %v4038_v60  ;;  %v5475_v7 = vpop.f32.mrb[43].mxu1  ;;  %v4406_v60 = vld [vmem:[#allocation7 + $0x138] sm:$0xff]  ;;  %v5790_v0 = vpack.c.bf16 %v4408_v63, %v4407_v62  ;;  %v4411_v4 = vld [vmem:[#allocation7 + $0x160] sm:$0xff] }
 0x284   :  { %v5787_v61 = vpack.c.bf16 %v4406_v60, %v4405_v59  ;;  %v4414_v7 = vld [vmem:[#allocation7 + $0x178] sm:$0xff] }
 0x285   :  { %v4118_v8 = vadd.f32 %v5473_v3, %v4078_v6  ;;  %v5793_v3 = vpack.c.bf16 %v4410_v2, %v4409_v1  ;;  %v4413_v6 = vld [vmem:[#allocation7 + $0x170] sm:$0xff] }
 0x29f   :  { %v5493_v9 = vpop.f32.mrb[44].mxu0 }
 0x2a0   :  { %v5515_v10 = vpop.f32.mrb[44].mxu1  ;;  %v5494_v11 = vpop.f32.mrb[45].mxu0 }
 0x2a1   :  { %v5516_v12 = vpop.f32.mrb[45].mxu1  ;;  %v5495_v13 = vadd.f32 %v5494_v11, %v5493_v9  ;;  %v5496_v15 = vpop.f32.mrb[46].mxu0  ;;  %v4495_v9 = vld [vmem:[#allocation7 + $0x180] sm:$0xff]  ;;  %v4497_v11 = vld [vmem:[#allocation7 + $0x190] sm:$0xff] }
 0x2a2   :  { %v5517_v14 = vadd.f32 %v5516_v12, %v5515_v10  ;;  %v5518_v16 = vpop.f32.mrb[46].mxu1  ;;  %v5497_v17 = vpop.f32.mrb[47].mxu0  ;;  %v4496_v10 = vld [vmem:[#allocation7 + $0x188] sm:$0xff]  ;;  %v4499_v15 = vld [vmem:[#allocation7 + $0x1a0] sm:$0xff] }
 0x2a3   :  { %v5519_v18 = vpop.f32.mrb[47].mxu1  ;;  %v4158_v19 = vadd.f32 %v5495_v13, %v4118_v8  ;;  %v5799_v8 = vpack.c.bf16 %v4414_v7, %v4413_v6  ;;  %v5802_v12 = vpack.c.bf16 %v4496_v10, %v4495_v9  ;;  %v4498_v13 = vld [vmem:[#allocation7 + $0x198] sm:$0xff]  ;;  %v4500_v16 = vld [vmem:[#allocation7 + $0x1a8] sm:$0xff] }
 0x2a4   :  { %v5808_v17 = vpack.c.bf16 %v4500_v16, %v4499_v15  ;;  %v4990_v18 = vld [vmem:[#allocation8 + $0x2] ss:$0 sm:$0xff] }
 0x2a5   :  { %v4198_v20 = vadd.f32 %v5517_v14, %v4158_v19  ;;  %v5805_v14 = vpack.c.bf16 %v4498_v13, %v4497_v11 }
 0x2a7   :  { %v4203_v21 = vmul.f32 0.5, %v4198_v20 }
 0x2a9   :  { %6221 = vtanh.f32 %v4203_v21 }
 0x2b3   :  { %v6222_v22 = vpop.eup %6221 }
 0x2b4   :  { %v4205_v23 = vmul.f32 0.5, %v6222_v22 }
 0x2b6   :  { %v4206_v24 = vadd.f32 0.5, %v4205_v23 }
 0x2b8   :  { %5622 = vmatmul.mubr.f32.vlgmr.msra.gmra.mrb[48].mxu0 %v4206_v24 }
 0x2b9   :  { %5691 = vmatprep.mubr.msk.f32.mxu0 %vm6356_vm0, %v6357_v26  ;;  %5779 = vmatpush3.bf16.msra.mxu0 %v5778_v44 }
 0x2ba   :  { %5780 = vmatprep.subr.bf16.mxu0 %v6355_v56 }
 0x2bd   :  { %5782 = vmatpush3.bf16.msra.mxu0 %v5781_v46 }
 0x2be   :  { %5783 = vmatprep.subr.bf16.mxu0 %v6355_v56 }
 0x2c1   :  { %5785 = vmatpush3.bf16.msra.mxu0 %v5784_v49 }
 0x2c2   :  { %5786 = vmatprep.subr.bf16.mxu0 %v6355_v56 }
 0x2c5   :  { %5788 = vmatpush3.bf16.msra.mxu0 %v5787_v61 }
 0x2c6   :  { %5789 = vmatprep.subr.bf16.mxu0 %v6355_v56 }
 0x2c9   :  { %5791 = vmatpush3.bf16.msra.mxu0 %v5790_v0 }
 0x2ca   :  { %5792 = vmatprep.subr.bf16.mxu0 %v6355_v56 }
 0x2cd   :  { %5794 = vmatpush3.bf16.msra.mxu0 %v5793_v3 }
 0x2ce   :  { %5795 = vmatprep.subr.bf16.mxu0 %v6355_v56 }
 0x38b   :  { %v4294_v51 = vpop.f32.mrb[48].mxu0 }
 0x38c   :  { %v4295_v52 = vadd.f32 %v4989_v50, %v4294_v51  ;;  %v5623_v53 = vpop.f32.mrb[49].mxu0  ;;  %v4992_v50 = vld [vmem:[#allocation8 + $0x4] ss:$0 sm:$0xff] }
 0x38e   :  { %v4298_v54 = vmul.f32 0.5, %v4295_v52 }
 0x390   :  { %6223 = vtanh.f32 %v4298_v54 }
 0x39a   :  { %v6224_v55 = vpop.eup %6223 }
 0x39b   :  { %v4300_v57 = vmul.f32 0.5, %v6224_v55 }
 0x39d   :  { %v4301_v58 = vadd.f32 0.5, %v4300_v57 }
 0x39f   :  { %5657 = vmatmul.mubr.f32.vlgmr.msra.gmra.mrb[48].mxu1 %v4301_v58 }
 0x3a0   :  { %5726 = vmatprep.mubr.msk.f32.mxu1 %vm6356_vm0, %v6357_v26  ;;  %v4412_v26 = vld [vmem:[#allocation7 + $0x168] sm:$0xff]  ;;  %5803 = vmatpush3.bf16.msra.mxu1 %v5802_v12 }
 0x3a1   :  { %v5796_v5 = vpack.c.bf16 %v4412_v26, %v4411_v4  ;;  %5804 = vmatprep.subr.bf16.mxu1 %v6355_v56 }
 0x3a3   :  { %5797 = vmatpush3.bf16.msra.mxu0 %v5796_v5 }
 0x3a4   :  { %5798 = vmatprep.subr.bf16.mxu0 %v6355_v56  ;;  %5806 = vmatpush3.bf16.msra.mxu1 %v5805_v14 }
 0x3a5   :  { %5807 = vmatprep.subr.bf16.mxu1 %v6355_v56 }
 0x3a7   :  { %5800 = vmatpush3.bf16.msra.mxu0 %v5799_v8 }
 0x3a8   :  { %5809 = vmatpush3.bf16.msra.mxu1 %v5808_v17 }
 0x3a9   :  { %5810 = vmatprep.subr.bf16.mxu1 %v6355_v56 }
 0x3ac   :  { %5812 = vmatpush3.bf16.msra.mxu1 %v5811_v29 }
 0x3ad   :  { %5813 = vmatprep.subr.bf16.mxu1 %v6355_v56 }
 0x3b0   :  { %5815 = vmatpush3.bf16.msra.mxu1 %v5814_v32 }
 0x3b1   :  { %5816 = vmatprep.subr.bf16.mxu1 %v6355_v56 }
 0x3b4   :  { %5818 = vmatpush3.bf16.msra.mxu1 %v5817_v35 }
 0x3b5   :  { %5819 = vmatprep.subr.bf16.mxu1 %v6355_v56 }
 0x3b8   :  { %5821 = vmatpush3.bf16.msra.mxu1 %v5820_v38 }
 0x3b9   :  { %5822 = vmatprep.subr.bf16.mxu1 %v6355_v56 }
 0x3bc   :  { %5824 = vmatpush3.bf16.msra.mxu1 %v5823_v41 }
 0x472   :  { %v4390_v19 = vpop.f32.mrb[48].mxu1 }
 0x473   :  { %v4391_v20 = vadd.f32 %v4990_v18, %v4390_v19  ;;  %v5658_v21 = vpop.f32.mrb[49].mxu1 }
 0x475   :  { %v4394_v22 = vmul.f32 0.5, %v4391_v20 }
 0x477   :  { %6225 = vtanh.f32 %v4394_v22 }
 0x481   :  { %v6226_v23 = vpop.eup %6225 }
 0x482   :  { %v4396_v24 = vmul.f32 0.5, %v6226_v23 }
 0x484   :  { %v4397_v25 = vadd.f32 0.5, %v4396_v24 }
 0x486   :  { %5692 = vmatmul.mubr.f32.vlgmr.msra.gmra.mrb[50].mxu0 %v4397_v25 }
 0x559   :  { %v4486_v43 = vpop.f32.mrb[50].mxu0 }
 0x55a   :  { %v4487_v44 = vadd.f32 %v4991_v42, %v4486_v43  ;;  %v5693_v45 = vpop.f32.mrb[51].mxu0 }
 0x55c   :  { %v4490_v46 = vmul.f32 0.5, %v4487_v44 }
 0x55e   :  { %6227 = vtanh.f32 %v4490_v46 }
 0x568   :  { %v6228_v47 = vpop.eup %6227 }
 0x569   :  { %v4492_v48 = vmul.f32 0.5, %v6228_v47 }
 0x56b   :  { %v4493_v49 = vadd.f32 0.5, %v4492_v48 }
 0x56d   :  { %5727 = vmatmul.mubr.f32.vlgmr.msra.gmra.mrb[50].mxu1 %v4493_v49 }
 0x640   :  { %v4582_v51 = vpop.f32.mrb[50].mxu1 }
 0x641   :  { %v4583_v52 = vadd.f32 %v4992_v50, %v4582_v51  ;;  %v5728_v56 = vpop.f32.mrb[51].mxu1 }
 0x643   :  { %4586 = vst [vmem:[#allocation10] sm:$0xff] %v4583_v52 }
 0x644   :  { %6328 = shalt.err (!%p6325_p8)
}
 0x645   :  { %s6329_s15 = scalar_lea.hbm %s6500_s4, 128 }
 0x646   :  { %p6330_p9 = scmp.ne.s32.totalorder %s6500_s4, %s6329_s15  ;;  %p6333_p10 = scmp.lt.u32.totalorder %s6329_s15, %s6500_s4 }
 0x648   :  { %p6335_p11 = pnand %p6333_p10, %p6330_p9 }
 0x64a   :  { %6338 = shalt.err (!%p6335_p11)
}
 0x64b   :  { %4596 = dma.vmem_to_hbm [thread:$0]  %s4594_s12, 128, %s6500_s4, [#allocation4]  }
 0x64c   :  { %6345 = dma.done.wait [#allocation4], 128  }
 0x64d   :  { %6346 = vsyncadd [#allocation4], 4294967168 }
 0x64e   :  { %4600 = vsyncpa [#allocation3], 1 }
 0x64f   :  { %4601 = vsyncpa [#allocation6], 1 }
 0x650   :  { %4602 = vsyncpa [#allocation9], 1 }
 0x651   :  { %4603 = vsyncpa [#allocation4], 1 }

</bundles_post_ra>
